<compile_context>
chip_gen: v7x
topology: tpu7x:2x2x1
jax: 0.10.0
libtpu: 0.0.40
codegen_flags: <defaults>
</compile_context>

<pallas_src>
import functools

import jax
import jax.numpy as jnp
import numpy as np
from jax.experimental import pallas as pl
from jax.experimental.pallas import tpu as pltpu

KK = 9    # 3x3 patch tokens per output location
KB = 16   # sublane-aligned token block used for the q/k sections of the stacked matmul


def _bf16_exp_ok() -> bool:
    # bf16 EUP exp helps on v6e/v7x; on v5e it only adds converts (perf review). Safe either way.
    try:
        return "v5" not in jax.devices()[0].device_kind.lower()
    except Exception:
        return True


_BF16_EXP = _bf16_exp_ok()


# ----------------------------------------------------------------------------
# Kernel: one [C*9, TN] lane tile of patch tokens -> [OC, TN] output tile.
#   p_ref  : [C*9, TN]            bf16  rows ordered (channel-major, token-minor)
#   w_ref  : [2*C*16+9*Cp+OC, C*9] bf16 stacked weights: q | k | v | avgpool-shortcut-conv
#   b_ref  : [2*C*16+9*Cp+OC, 1]  f32   stacked biases (conv bias folded into the pool section)
#   wo_ref : [OC, 9*Cp]           bf16  (1/9)*wc tiled over tokens (attention output path)
# ----------------------------------------------------------------------------
def scan_layer_kernel(p_ref, w_ref, b_ref, wo_ref, o_ref, *, C, Cp, OC, bf16_exp):
    P = p_ref[...]                                       # [C*9, TN] bf16
    TN = P.shape[1]
    C16 = C * KB

    # --- one stacked MXU matmul: q/k/v projections + (AvgPool2d(2,2) -> 1x1 conv + bias) ---
    R = jnp.dot(w_ref[...], P, preferred_element_type=jnp.float32) + b_ref[...]

    # --- attention scores s[i,j,n] = sum_c q[(c,i),n]*k[(c,j),n]; 1/sqrt(C) folded into W_q ---
    # TODO(synk): switch to lax.fori_loop(unroll=True) over channel blocks if C grows past ~8.
    s = None
    for c in range(C):
        qc = R[c * KB:c * KB + KK]                       # [9, TN] 16-aligned start -> free view
        kc = R[C16 + c * KB:C16 + c * KB + KK]           # [9, TN]
        term = qc[:, None, :] * kc[None, :, :]           # [9, 9, TN]
        s = term if s is None else s + term

    # --- softmax over j without materializing the normalized A tensor ---
    # Padded lanes carry all-zero columns: scores are finite, softmax is exp(0)/9 — no Inf/NaN.
    m = jnp.max(s, axis=1, keepdims=True)                # [9, 1, TN]
    z = s - m
    e = jnp.exp(z.astype(jnp.bfloat16)).astype(jnp.float32) if bf16_exp else jnp.exp(z)
    d = jnp.sum(e, axis=1, keepdims=True)                # [9, 1, TN]
    r = pl.reciprocal(d, approx=True)                    # EUP slot (free vs VPU divide)
    abar = jnp.sum(e * r, axis=0)                        # [9, TN] = sum_i A[i, :, :]

    # --- outway='avg' + 1x1 conv: weight V (token-major, channel-padded) by abar, one MXU pass;
    #     the 1/9 averaging is folded into wo_ref ---
    v = R[2 * C16:2 * C16 + KK * Cp]                     # [9*Cp, TN] (padded channels are 0)
    av = (v.reshape(KK, Cp, TN) * abar[:, None, :]).reshape(KK * Cp, TN).astype(jnp.bfloat16)
    pool = R[2 * C16 + KK * Cp:2 * C16 + KK * Cp + OC]   # [OC, TN] shortcut path (has conv bias)
    y = jnp.dot(wo_ref[...], av, preferred_element_type=jnp.float32) + pool
    o_ref[...] = y.astype(o_ref.dtype)                   # lane-dense store


# ----------------------------------------------------------------------------
# Wrapper: NCHW -> [c*9, N] patch rows (zero-pad 1, 3x3 kernel, stride 2), build stacked
# trace-time weights so every channel contraction is an MXU matmul, tile N on the lanes.
# ----------------------------------------------------------------------------
@jax.jit
def scan_layer_forward(x, wq, bq, wk, bk, wv, bv, wc, bc):
    b, c, h, w = x.shape
    assert h % 2 == 0 and w % 2 == 0
    H2, W2 = h // 2, w // 2
    N = b * H2 * W2
    outc = wc.shape[0]
    C9 = c * KK
    C16 = c * KB
    Cp = ((c + 7) // 8) * 8                              # channel pad for the v section

    # --- lane tiling: round N to 128, pick largest tile that divides it exactly (no waste) ---
    n_pad = pl.cdiv(N, 128) * 128
    tn = 128
    for cand in (1024, 512, 256):
        if n_pad % cand == 0:
            tn = cand
            break
    if n_pad // tn < 2 and tn > 128:                     # v7x: give both TensorCores a grid step
        tn //= 2

    # --- unfold: 3x3 patches, padding=1, stride=2 -> rows c*9 + (di*3+dj), cols (b, H2, W2) ---
    # TODO(synk): build patches in-kernel (halo'd bands) to remove this 2.25x HBM materialization.
    xp = jnp.pad(x, ((0, 0), (0, 0), (1, 1), (1, 1)))
    pats = [xp[:, :, di:di + h:2, dj:dj + w:2] for di in range(3) for dj in range(3)]
    P = jnp.stack(pats, axis=0)                          # [9, b, c, H2, W2]
    P = P.transpose(2, 0, 1, 3, 4).reshape(C9, N)        # row = c*9 + token
    P = jnp.pad(P, ((0, 0), (0, n_pad - N))).astype(jnp.bfloat16)

    # --- stacked weights/biases (tiny, trace-time): q | k | v | avgpool-shortcut-conv ---
    scale = float(c) ** -0.5
    eye_kb = jnp.eye(KB, KK, dtype=jnp.float32)          # 16x9: token rows 9..15 are zero
    w_q = jnp.kron(wq.T * scale, eye_kb)                 # [C16, C9], rows c*16 + t
    w_k = jnp.kron(wk.T, eye_kb)                         # [C16, C9]
    wvT_p = jnp.pad(wv.T, ((0, Cp - c), (0, 0)))         # [Cp, C]
    w_v = jnp.einsum('oc,tu->tocu', wvT_p,
                     jnp.eye(KK, dtype=jnp.float32)).reshape(KK * Cp, C9)   # rows t*Cp + c
    pool_mask = jnp.zeros((KK,), jnp.float32).at[jnp.array([4, 5, 7, 8])].set(0.25)
    w_pool = jnp.kron(wc, pool_mask[None, :])            # [outc, C9]: AvgPool2d(2,2) + 1x1 conv
    w_stk = jnp.concatenate([w_q, w_k, w_v, w_pool], axis=0).astype(jnp.bfloat16)

    tok_mask = (jnp.arange(KB) < KK).astype(jnp.float32)
    b_q = jnp.kron(bq * scale, tok_mask)
    b_k = jnp.kron(bk, tok_mask)
    b_v = jnp.tile(jnp.pad(bv, (0, Cp - c)), KK)
    b_stk = jnp.concatenate([b_q, b_k, b_v, bc])[:, None].astype(jnp.float32)
    m_stk = 2 * C16 + KK * Cp + outc

    # attention-path output weight: (1/9)*wc tiled over the 9 tokens, token-major columns.
    w_out = jnp.tile(jnp.pad(wc, ((0, 0), (0, Cp - c))) * (1.0 / KK),
                     (1, KK)).astype(jnp.bfloat16)       # [outc, 9*Cp]

    kernel = functools.partial(scan_layer_kernel, C=c, Cp=Cp, OC=outc, bf16_exp=_BF16_EXP)
    y = pl.pallas_call(
        kernel,
        out_shape=jax.ShapeDtypeStruct((outc, n_pad), jnp.float32),
        grid_spec=pltpu.PrefetchScalarGridSpec(
            num_scalar_prefetch=0,
            grid=(n_pad // tn,),
            in_specs=[pl.BlockSpec((C9, tn), lambda n: (0, n)),
                      pl.BlockSpec((m_stk, C9), lambda n: (0, 0)),   # resident weights
                      pl.BlockSpec((m_stk, 1), lambda n: (0, 0)),
                      pl.BlockSpec((outc, KK * Cp), lambda n: (0, 0))],
            out_specs=pl.BlockSpec((outc, tn), lambda n: (0, n)),
        ),
        compiler_params=pltpu.CompilerParams(
            dimension_semantics=("parallel",),
            vmem_limit_bytes=32 * 1024 * 1024),
    )(P, w_stk, b_stk, w_out)

    return y[:, :N].reshape(outc, b, H2, W2).transpose(1, 0, 2, 3)   # [b, outc, H2, W2]


# ----------------------------------------------------------------------------
# Pure-JAX f32 reference (same reconstructed math) for a correctness check.
# ----------------------------------------------------------------------------
def scan_layer_reference(x, wq, bq, wk, bk, wv, bv, wc, bc):
    b, c, h, w = x.shape
    H2, W2 = h // 2, w // 2
    # shortcut AvgPool2d(2,2)
    t = x.reshape(b, c, H2, 2, W2, 2).mean(axis=(3, 5))
    # SCANN (reconstructed)
    xp = jnp.pad(x, ((0, 0), (0, 0), (1, 1), (1, 1)))
    pats = [xp[:, :, di:di + h:2, dj:dj + w:2][:, :, :H2, :W2]
            for di in range(3) for dj in range(3)]
    P = jnp.stack(pats, axis=2)                          # [b, c, 9, H2, W2]
    P = P.transpose(0, 3, 4, 2, 1).reshape(b * H2 * W2, 9, c)
    Q = P @ wq + bq
    K = P @ wk + bk
    V = P @ wv + bv
    S = jnp.einsum('nic,njc->nij', Q, K) / jnp.sqrt(jnp.float32(c))
    A = jax.nn.softmax(S, axis=-1)
    O = jnp.einsum('nij,njc->nic', A, V)
    s = O.mean(axis=1).reshape(b, H2, W2, c).transpose(0, 3, 1, 2)
    z = t + s
    y = jnp.einsum('bchw,oc->bohw', z, wc) + bc[None, :, None, None]
    return y


if __name__ == "__main__":
    b, inc, outc, h, w = 2, 4, 8, 16, 16

    key = jax.random.PRNGKey(0)
    kx, kq, kkk, kv, kc, kbq, kbk, kbv, kbc = jax.random.split(key, 9)
    x = jax.random.normal(kx, (b, inc, h, w), jnp.float32)

    # deterministic parameter init (shapes from SCANlayer.__init__ / reconstructed SCANN)
    wq = 0.3 * jax.random.normal(kq, (inc, inc), jnp.float32)
    wk = 0.3 * jax.random.normal(kkk, (inc, inc), jnp.float32)
    wv = 0.3 * jax.random.normal(kv, (inc, inc), jnp.float32)
    bq = 0.1 * jax.random.normal(kbq, (inc,), jnp.float32)
    bk = 0.1 * jax.random.normal(kbk, (inc,), jnp.float32)
    bv = 0.1 * jax.random.normal(kbv, (inc,), jnp.float32)
    wc = 0.3 * jax.random.normal(kc, (outc, inc), jnp.float32)   # Conv2d(inc,outc,1) weight
    bc = 0.1 * jax.random.normal(kbc, (outc,), jnp.float32)

    y = scan_layer_forward(x, wq, bq, wk, bk, wv, bv, wc, bc)
    y = jax.block_until_ready(y)

    y_ref = scan_layer_reference(x, wq, bq, wk, bk, wv, bv, wc, bc)
    # bf16 MXU operands / bf16 exp / approx reciprocal (f32 accumulation) -> relaxed tolerance.
    np.testing.assert_allclose(np.asarray(y), np.asarray(y_ref), rtol=5e-2, atol=5e-2)
    assert y.shape == (b, outc, h // 2, w // 2)

    print("KERNEL_OK")
</pallas_src>

<mosaic_0001>
module attributes {stable_mosaic.version = 11 : i64} {
  func.func @scan_layer_kernel(%arg0: i32, %arg1: memref<36x128xbf16, #tpu.memory_space<vmem>>, %arg2: memref<208x36xbf16, #tpu.memory_space<vmem>>, %arg3: memref<208x1xf32, #tpu.memory_space<vmem>>, %arg4: memref<8x72xbf16, #tpu.memory_space<vmem>>, %arg5: memref<8x128xf32, #tpu.memory_space<vmem>>) attributes {dimension_semantics = [#tpu.dimension_semantics<parallel>], iteration_bounds = array<i64: 1>, scalar_prefetch = 0 : i64, scratch_operands = 0 : i64, tpu.core_type = #tpu.core_type<tc>, window_params = [{transform_indices = @transform_0, window_bounds = array<i64: 36, 128>}, {pipeline_mode = #tpu.pipeline_mode<synchronous>, transform_indices = @transform_1, window_bounds = array<i64: 208, 36>}, {pipeline_mode = #tpu.pipeline_mode<synchronous>, transform_indices = @transform_2, window_bounds = array<i64: 208, 1>}, {pipeline_mode = #tpu.pipeline_mode<synchronous>, transform_indices = @transform_3, window_bounds = array<i64: 8, 72>}, {transform_indices = @transform_4, window_bounds = array<i64: 8, 128>}]} {
    %c0 = arith.constant 0 : index
    %c0_0 = arith.constant 0 : index
    %0 = vector.load %arg1[%c0, %c0_0] : memref<36x128xbf16, #tpu.memory_space<vmem>>, vector<36x128xbf16>
    %c0_1 = arith.constant 0 : index
    %c0_2 = arith.constant 0 : index
    %1 = vector.load %arg2[%c0_1, %c0_2] : memref<208x36xbf16, #tpu.memory_space<vmem>>, vector<208x36xbf16>
    %cst = arith.constant dense<0.000000e+00> : vector<208x128xf32>
    %2 = tpu.matmul %1, %0, %cst {dimension_numbers = #tpu.dot_dimension_numbers<[1], [0], [0], [1], [0, 0, 1, 1], [], []>} : vector<208x36xbf16>, vector<36x128xbf16>, vector<208x128xf32> -> vector<208x128xf32>
    %c0_3 = arith.constant 0 : index
    %c0_4 = arith.constant 0 : index
    %3 = vector.load %arg3[%c0_3, %c0_4] : memref<208x1xf32, #tpu.memory_space<vmem>>, vector<208x1xf32>
    %4 = vector.broadcast %3 : vector<208x1xf32> to vector<208x128xf32>
    %5 = arith.addf %2, %4 : vector<208x128xf32>
    %6 = vector.extract_strided_slice %5 {offsets = [0, 0], sizes = [9, 128], strides = [1, 1]} : vector<208x128xf32> to vector<9x128xf32>
    %7 = vector.extract_strided_slice %5 {offsets = [64, 0], sizes = [9, 128], strides = [1, 1]} : vector<208x128xf32> to vector<9x128xf32>
    %8 = vector.shape_cast %6 : vector<9x128xf32> to vector<9x1x128xf32>
    %9 = vector.shape_cast %7 : vector<9x128xf32> to vector<1x9x128xf32>
    %10 = vector.broadcast %8 : vector<9x1x128xf32> to vector<9x9x128xf32>
    %11 = vector.broadcast %9 : vector<1x9x128xf32> to vector<9x9x128xf32>
    %12 = arith.mulf %10, %11 : vector<9x9x128xf32>
    %13 = vector.extract_strided_slice %5 {offsets = [16, 0], sizes = [9, 128], strides = [1, 1]} : vector<208x128xf32> to vector<9x128xf32>
    %14 = vector.extract_strided_slice %5 {offsets = [80, 0], sizes = [9, 128], strides = [1, 1]} : vector<208x128xf32> to vector<9x128xf32>
    %15 = vector.shape_cast %13 : vector<9x128xf32> to vector<9x1x128xf32>
    %16 = vector.shape_cast %14 : vector<9x128xf32> to vector<1x9x128xf32>
    %17 = vector.broadcast %15 : vector<9x1x128xf32> to vector<9x9x128xf32>
    %18 = vector.broadcast %16 : vector<1x9x128xf32> to vector<9x9x128xf32>
    %19 = arith.mulf %17, %18 : vector<9x9x128xf32>
    %20 = arith.addf %12, %19 : vector<9x9x128xf32>
    %21 = vector.extract_strided_slice %5 {offsets = [32, 0], sizes = [9, 128], strides = [1, 1]} : vector<208x128xf32> to vector<9x128xf32>
    %22 = vector.extract_strided_slice %5 {offsets = [96, 0], sizes = [9, 128], strides = [1, 1]} : vector<208x128xf32> to vector<9x128xf32>
    %23 = vector.shape_cast %21 : vector<9x128xf32> to vector<9x1x128xf32>
    %24 = vector.shape_cast %22 : vector<9x128xf32> to vector<1x9x128xf32>
    %25 = vector.broadcast %23 : vector<9x1x128xf32> to vector<9x9x128xf32>
    %26 = vector.broadcast %24 : vector<1x9x128xf32> to vector<9x9x128xf32>
    %27 = arith.mulf %25, %26 : vector<9x9x128xf32>
    %28 = arith.addf %20, %27 : vector<9x9x128xf32>
    %29 = vector.extract_strided_slice %5 {offsets = [48, 0], sizes = [9, 128], strides = [1, 1]} : vector<208x128xf32> to vector<9x128xf32>
    %30 = vector.extract_strided_slice %5 {offsets = [112, 0], sizes = [9, 128], strides = [1, 1]} : vector<208x128xf32> to vector<9x128xf32>
    %31 = vector.shape_cast %29 : vector<9x128xf32> to vector<9x1x128xf32>
    %32 = vector.shape_cast %30 : vector<9x128xf32> to vector<1x9x128xf32>
    %33 = vector.broadcast %31 : vector<9x1x128xf32> to vector<9x9x128xf32>
    %34 = vector.broadcast %32 : vector<1x9x128xf32> to vector<9x9x128xf32>
    %35 = arith.mulf %33, %34 : vector<9x9x128xf32>
    %36 = arith.addf %28, %35 : vector<9x9x128xf32>
    %cst_5 = arith.constant dense<0xFF800000> : vector<9x128xf32>
    %37 = vector.multi_reduction <maximumf>, %36, %cst_5 [1] : vector<9x9x128xf32> to vector<9x128xf32>
    %38 = vector.shape_cast %37 : vector<9x128xf32> to vector<9x1x128xf32>
    %39 = vector.broadcast %38 : vector<9x1x128xf32> to vector<9x9x128xf32>
    %40 = arith.subf %36, %39 : vector<9x9x128xf32>
    %41 = arith.truncf %40 : vector<9x9x128xf32> to vector<9x9x128xbf16>
    %42 = math.exp %41 : vector<9x9x128xbf16>
    %43 = arith.extf %42 : vector<9x9x128xbf16> to vector<9x9x128xf32>
    %cst_6 = arith.constant dense<0.000000e+00> : vector<9x128xf32>
    %44 = vector.multi_reduction <add>, %43, %cst_6 [1] : vector<9x9x128xf32> to vector<9x128xf32>
    %45 = vector.shape_cast %44 : vector<9x128xf32> to vector<9x1x128xf32>
    %46 = tpu.reciprocal %45 {approx = true} : vector<9x1x128xf32> -> vector<9x1x128xf32>
    %47 = vector.broadcast %46 : vector<9x1x128xf32> to vector<9x9x128xf32>
    %48 = arith.mulf %43, %47 : vector<9x9x128xf32>
    %cst_7 = arith.constant dense<0.000000e+00> : vector<9x128xf32>
    %49 = vector.multi_reduction <add>, %48, %cst_7 [0] : vector<9x9x128xf32> to vector<9x128xf32>
    %50 = vector.extract_strided_slice %5 {offsets = [128, 0], sizes = [72, 128], strides = [1, 1]} : vector<208x128xf32> to vector<72x128xf32>
    %51 = vector.shape_cast %50 : vector<72x128xf32> to vector<9x8x128xf32>
    %52 = vector.shape_cast %49 : vector<9x128xf32> to vector<9x1x128xf32>
    %53 = vector.broadcast %52 : vector<9x1x128xf32> to vector<9x8x128xf32>
    %54 = arith.mulf %51, %53 : vector<9x8x128xf32>
    %55 = vector.shape_cast %54 : vector<9x8x128xf32> to vector<72x128xf32>
    %56 = arith.truncf %55 : vector<72x128xf32> to vector<72x128xbf16>
    %57 = vector.extract_strided_slice %5 {offsets = [200, 0], sizes = [8, 128], strides = [1, 1]} : vector<208x128xf32> to vector<8x128xf32>
    %c0_8 = arith.constant 0 : index
    %c0_9 = arith.constant 0 : index
    %58 = vector.load %arg4[%c0_8, %c0_9] : memref<8x72xbf16, #tpu.memory_space<vmem>>, vector<8x72xbf16>
    %cst_10 = arith.constant dense<0.000000e+00> : vector<8x128xf32>
    %59 = tpu.matmul %58, %56, %cst_10 {dimension_numbers = #tpu.dot_dimension_numbers<[1], [0], [0], [1], [0, 0, 1, 1], [], []>} : vector<8x72xbf16>, vector<72x128xbf16>, vector<8x128xf32> -> vector<8x128xf32>
    %60 = arith.addf %59, %57 : vector<8x128xf32>
    %c0_11 = arith.constant 0 : index
    %c0_12 = arith.constant 0 : index
    %61 = vector.load %arg5[%c0_11, %c0_12] : memref<8x128xf32, #tpu.memory_space<vmem>>, vector<8x128xf32>
    tpu.vector_store %arg5[%c0_11, %c0_12], %60 {strides = array<i32>} : memref<8x128xf32, #tpu.memory_space<vmem>>, vector<8x128xf32>,
    return
  }
  func.func @transform_0(%arg0: i32) -> (i32, i32) {
    %c0_i32 = arith.constant 0 : i32
    %c0_i32_0 = arith.constant 0 : i32
    return %c0_i32, %arg0 : i32, i32
  }
  func.func @transform_1(%arg0: i32) -> (i32, i32) {
    %c0_i32 = arith.constant 0 : i32
    %c0_i32_0 = arith.constant 0 : i32
    %c0_i32_1 = arith.constant 0 : i32
    return %c0_i32, %c0_i32_0 : i32, i32
  }
  func.func @transform_2(%arg0: i32) -> (i32, i32) {
    %c0_i32 = arith.constant 0 : i32
    %c0_i32_0 = arith.constant 0 : i32
    %c0_i32_1 = arith.constant 0 : i32
    return %c0_i32, %c0_i32_0 : i32, i32
  }
  func.func @transform_3(%arg0: i32) -> (i32, i32) {
    %c0_i32 = arith.constant 0 : i32
    %c0_i32_0 = arith.constant 0 : i32
    %c0_i32_1 = arith.constant 0 : i32
    return %c0_i32, %c0_i32_0 : i32, i32
  }
  func.func @transform_4(%arg0: i32) -> (i32, i32) {
    %c0_i32 = arith.constant 0 : i32
    %c0_i32_0 = arith.constant 0 : i32
    return %c0_i32, %arg0 : i32, i32
  }
}

</mosaic_0001>

<bundles_post_ra>
// kernel: tile.13
= control target key start
LH: loop header
LB: loop body
LE: loop exit
PB: predicated region body
PF: predicated region fallthrough
CT: control target
= control target key end

     0   :  { %s28_s0 = inlined_call_operand.vmem [shape: f32[8], index: 0, kind: input, shape index: {}]   ;;  %s29_s1 = inlined_call_operand.vmem [shape: f32[9,8], index: 1, kind: output, shape index: {}]  }
   0x1   :  { %v4_v0 = vld [vmem:[%s28_s0] ss:$0 sm:$0xff] }
   0x2   :  { %5 = vst [vmem:[%s29_s1] sm:$0xff] %v4_v0  ;;  %8 = vst [vmem:[%s29_s1 + $0x8] sm:$0xff] %v4_v0 }

// kernel: tile.14
= control target key start
LH: loop header
LB: loop body
LE: loop exit
PB: predicated region body
PF: predicated region fallthrough
CT: control target
= control target key end

     0   :  { %s75_s10 = smov 64   ;;  %s76_s11 = smov 48   ;;  %vm3_vm0 = vcmask 64512   ;;  %vm9_vm1 = vcmask 589312   ;;  %vm15_vm2 = vcmask 523712   ;;  %vm21_vm3 = vcmask 458112   ;;  %s123_s0 = inlined_call_operand.vmem [shape: f32[9,8], index: 0, kind: input, shape index: {}]   ;;  %s124_s1 = inlined_call_operand.vmem [shape: f32[72], index: 1, kind: output, shape index: {}]  }
   0x1   :  { %v59_v0 = vld [vmem:[%s123_s0 + $0x8] sm:$0x1]   ;;  %v61_v1 = vld [vmem:[%s123_s0 + $0x6] sm:$0x1]   ;;  %v60_v2 = vld [vmem:[%s123_s0 + $0x7] sm:$0x1]  }
   0x2   :  { %7 = vrot.lane.b32.xlu0 %v59_v0, %s75_s10  ;;  %19 = vrot.lane.b32.xlu1 %v61_v1, %s76_s11  ;;  %v62_v3 = vld [vmem:[%s123_s0 + $0x5] sm:$0x1]   ;;  %v2_v4 = vld [vmem:[%s123_s0] sm:$0x1]   ;;  %s77_s18 = smov 56   ;;  %s78_s19 = smov 40  }
   0x3   :  { %4 = vst.msk [vmem:[#allocation0] sm:$0x1] %vm3_vm0, %v2_v4   ;;  %v63_v5 = vld [vmem:[%s123_s0 + $0x4] sm:$0x1]   ;;  %v64_v6 = vld [vmem:[%s123_s0 + $0x3] sm:$0x1]  }
   0x4   :  { %s79_s24 = smov 32   ;;  %s80_s25 = smov 24   ;;  %v65_v7 = vld [vmem:[%s123_s0 + $0x2] sm:$0x1]   ;;  %v66_v8 = vld [vmem:[%s123_s0 + $0x1] sm:$0x1]  }
   0x5   :  { %s81_s0 = smov 16   ;;  %s82_s30 = smov 8   ;;  %vm27_vm4 = vcmask 392512   ;;  %vm33_vm5 = vcmask 326912   ;;  %vm39_vm6 = vcmask 261312   ;;  %vm45_vm7 = vcmask 195712  }
   0x6   :  { %13 = vrot.lane.b32.xlu0 %v60_v2, %s77_s18  ;;  %25 = vrot.lane.b32.xlu1 %v62_v3, %s78_s19  ;;  %vm51_vm8 = vcmask 130112  }
   0xa   :  { %31 = vrot.lane.b32.xlu0 %v63_v5, %s79_s24  ;;  %37 = vrot.lane.b32.xlu1 %v64_v6, %s80_s25 }
   0xe   :  { %43 = vrot.lane.b32.xlu0 %v65_v7, %s81_s0  ;;  %49 = vrot.lane.b32.xlu1 %v66_v8, %s82_s30 }
  0x74   :  { %v8_v9 = vpop.permute.xlu0 %7   ;;  %v20_v10 = vpop.permute.xlu1 %19  }
  0x75   :  { %10 = vst.msk [vmem:[#allocation0] sm:$0x1] %vm9_vm1, %v8_v9  }
  0x78   :  { %v14_v11 = vpop.permute.xlu0 %13   ;;  %v26_v12 = vpop.permute.xlu1 %25  }
  0x79   :  { %16 = vst.msk [vmem:[#allocation0] sm:$0x1] %vm15_vm2, %v14_v11  }
  0x7a   :  { %22 = vst.msk [vmem:[#allocation0] sm:$0x1] %vm21_vm3, %v20_v10  }
  0x7b   :  { %28 = vst.msk [vmem:[#allocation0] sm:$0x1] %vm27_vm4, %v26_v12  }
  0x7c   :  { %v32_v13 = vpop.permute.xlu0 %31   ;;  %v38_v14 = vpop.permute.xlu1 %37  }
  0x7d   :  { %34 = vst.msk [vmem:[#allocation0] sm:$0x1] %vm33_vm5, %v32_v13  }
  0x7e   :  { %40 = vst.msk [vmem:[#allocation0] sm:$0x1] %vm39_vm6, %v38_v14  }
  0x80   :  { %v44_v15 = vpop.permute.xlu0 %43   ;;  %v50_v16 = vpop.permute.xlu1 %49  }
  0x81   :  { %46 = vst.msk [vmem:[#allocation0] sm:$0x1] %vm45_vm7, %v44_v15  }
  0x82   :  { %52 = vst.msk [vmem:[#allocation0] sm:$0x1] %vm51_vm8, %v50_v16  }
  0x89   :  { %v56_v17 = vld [vmem:[#allocation0] sm:$0x1] }
  0x8a   :  { %58 = vst [vmem:[%s124_s1] sm:$0x1] %v56_v17 }

// kernel: scan_layer_forward.1
= control target key start
LH: loop header
LB: loop body
LE: loop exit
PB: predicated region body
PF: predicated region fallthrough
CT: control target
= control target key end

     0   :  { %v2450_v0 = vmov 0.0   ;;  %vm1668_vm0 = vmmov 0   ;;  %vm325_vm1 = vcmask 1041408   ;;  %v1669_v4 = vmov 0   ;;  %s2445_s0 = inlined_call_operand.vmem [shape: bf16[36,128], index: 0, kind: input, shape index: {}]   ;;  %s2446_s1 = inlined_call_operand.vmem [shape: bf16[208,36], index: 1, kind: input, shape index: {}]   ;;  %s2447_s2 = inlined_call_operand.vmem [shape: f32[208,1], index: 2, kind: input, shape index: {}]   ;;  %s2448_s3 = inlined_call_operand.vmem [shape: bf16[8,72], index: 3, kind: input, shape index: {}]   ;;  %s2449_s4 = inlined_call_operand.vmem [shape: f32[8,128], index: 4, kind: output, shape index: {}]  }
   0x1   :  { %1531 = vmatprep.subr.bf16.mxu0 %v2450_v0  ;;  %1603 = vmatprep.subr.bf16.mxu1 %v2450_v0  ;;  %v1615_v1 = vld [vmem:[%s2445_s0] sm:$0xff]   ;;  %v1616_v2 = vld [vmem:[%s2445_s0 + $0x8] sm:$0xff]   ;;  %v1617_v3 = vld [vmem:[%s2445_s0 + $0x10] ss:$0 sps:$4 sm:$0x33]   ;;  %vm285_vm2 = vcmask 293888   ;;  %v472_v56 = vlaneseq }
   0x2   :  { %1537 = vmatprep.mubr.msk.bf16.mxu0 %vm1668_vm0, %v2450_v0  ;;  %1565 = vmatprep.mubr.msk.bf16.mxu1 %vm1668_vm0, %v2450_v0  ;;  %v327_v5 = vsel %vm325_vm1, %v1617_v3, 0  ;;  %v1618_v6 = vld [vmem:[%s2446_s1] sm:$0xff]   ;;  %v1619_v7 = vld [vmem:[%s2446_s1 + $0x38] sm:$0xff]   ;;  %v1620_v10 = vld [vmem:[%s2446_s1 + $0x8] sm:$0xff]   ;;  %v1670_v54 = vmov 1966171168  }
   0x3   :  { %1532 = vmatpush3.bf16.msra.mxu0 %v1615_v1  ;;  %1606 = vmatpush3.bf16.msra.mxu1 %v1615_v1  ;;  %v49_v8 = vld [vmem:[%s2447_s2] sm:$0xff]  ;;  %v51_v12 = vld [vmem:[%s2447_s2 + $0x10] sm:$0xff]  ;;  %v58_v14 = vld [vmem:[%s2447_s2 + $0x48] sm:$0xff]  ;;  %v470_v55 = vunpack.c.l.s4 %v1670_v54  ;;  %v473_v58 = vshrl.u32 %v472_v56, 7  ;;  %vm1032_vm3 = vcmask 1040384   ;;  %vm1430_vm4 = vcmask 1043456  }
   0x4   :  { %1533 = vmatprep.subr.bf16.mxu0 %v2450_v0  ;;  %1604 = vmatprep.subr.bf16.mxu1 %v2450_v0  ;;  %v53_v9 = vld [vmem:[%s2447_s2 + $0x20] sm:$0xff]  ;;  %v55_v13 = vld [vmem:[%s2447_s2 + $0x30] sm:$0xff]  ;;  %v60_v15 = vld [vmem:[%s2447_s2 + $0x58] sm:$0xff]  ;;  %vm1426_vm5 = vcmask 588800  }
   0x5   :  { %1613 = vset.pattern.permute.xlu0 %v1669_v4  ;;  %1614 = vset.pattern.permute.xlu1 %v1669_v4  ;;  %v1621_v11 = vld [vmem:[%s2446_s1 + $0x40] sm:$0xff]   ;;  %v1622_v16 = vld [vmem:[%s2446_s1 + $0x10] sm:$0xff]   ;;  %v1623_v17 = vld [vmem:[%s2446_s1 + $0x48] sm:$0xff]   ;;  %v471_v57 = vunpack.c.0.s8 %v470_v55 }
   0x6   :  { %77 = vperm.xlu0 %1613, %v49_v8   ;;  %97 = vperm.xlu1 %1614, %v53_v9   ;;  %v57_v18 = vld [vmem:[%s2447_s2 + $0x40] sm:$0xff]  ;;  %v59_v19 = vld [vmem:[%s2447_s2 + $0x50] sm:$0xff]  ;;  %v62_v20 = vld [vmem:[%s2447_s2 + $0x68] sm:$0xff] }
   0x7   :  { %1534 = vmatpush3.bf16.msra.mxu0 %v1616_v2  ;;  %1607 = vmatpush3.bf16.msra.mxu1 %v1616_v2  ;;  %v61_v21 = vld [vmem:[%s2447_s2 + $0x60] sm:$0xff]  ;;  %v1624_v22 = vld [vmem:[%s2446_s1 + $0x18] sm:$0xff]   ;;  %v1625_v23 = vld [vmem:[%s2446_s1 + $0x50] sm:$0xff]   ;;  %v1884_v3 = vsub.s32 %v471_v57, %v473_v58 }
   0x8   :  { %1535 = vmatprep.subr.bf16.mxu0 %v2450_v0  ;;  %1605 = vmatprep.subr.bf16.mxu1 %v2450_v0  ;;  %v64_v24 = vld [vmem:[%s2447_s2 + $0x78] sm:$0xff]  ;;  %v63_v25 = vld [vmem:[%s2447_s2 + $0x70] sm:$0xff]  ;;  %v50_v26 = vld [vmem:[%s2447_s2 + $0x8] sm:$0xff] }
   0x9   :  { %v52_v27 = vld [vmem:[%s2447_s2 + $0x18] sm:$0xff]  ;;  %v1626_v28 = vld [vmem:[%s2446_s1 + $0x20] sm:$0xff]   ;;  %v54_v30 = vld [vmem:[%s2447_s2 + $0x28] sm:$0xff]  ;;  %2455 = vst [vmem:[#allocation2_spill] sm:$0xff] %v1884_v3 }
   0xa   :  { %87 = vperm.xlu0 %1613, %v51_v12   ;;  %107 = vperm.xlu1 %1614, %v55_v13   ;;  %v1627_v29 = vld [vmem:[%s2446_s1 + $0x58] sm:$0xff]   ;;  %v65_v32 = vld [vmem:[%s2447_s2 + $0x80] sm:$0xff]  ;;  %v66_v33 = vld [vmem:[%s2447_s2 + $0x88] sm:$0xff] }
   0xb   :  { %1536 = vmatpush3.bf16.msra.mxu0 %v327_v5  ;;  %1608 = vmatpush3.bf16.msra.mxu1 %v327_v5  ;;  %v56_v31 = vld [vmem:[%s2447_s2 + $0x38] sm:$0xff]  ;;  %v1628_v34 = vld [vmem:[%s2446_s1 + $0x28] sm:$0xff]   ;;  %v1629_v35 = vld [vmem:[%s2446_s1 + $0x60] sm:$0xff]  }
   0xc   :  { %1589 = vmatprep.subr.bf16.mxu1 %v2450_v0  ;;  %v67_v36 = vld [vmem:[%s2447_s2 + $0x90] sm:$0xff]  ;;  %v68_v37 = vld [vmem:[%s2447_s2 + $0x98] sm:$0xff]  ;;  %v69_v38 = vld [vmem:[%s2447_s2 + $0xa0] sm:$0xff] }
   0xd   :  { %v70_v39 = vld [vmem:[%s2447_s2 + $0xa8] sm:$0xff]  ;;  %v1630_v40 = vld [vmem:[%s2446_s1 + $0x30] sm:$0xff]   ;;  %v72_v42 = vld [vmem:[%s2447_s2 + $0xb8] sm:$0xff] }
   0xe   :  { %1538 = vmatmul.mubr.msk.bf16.vlgmr.msra.gmra.mrb[0].mxu0 %vm285_vm2, %v1618_v6  ;;  %1566 = vmatmul.mubr.msk.bf16.vlgmr.msra.gmra.mrb[0].mxu1 %vm285_vm2, %v1619_v7  ;;  %v71_v41 = vld [vmem:[%s2447_s2 + $0xb0] sm:$0xff]  ;;  %v73_v43 = vld [vmem:[%s2447_s2 + $0xc0] sm:$0xff]  ;;  %v74_v44 = vld [vmem:[%s2447_s2 + $0xc8] sm:$0xff] }
   0xf   :  { %1541 = vmatprep.mubr.msk.bf16.mxu0 %vm1668_vm0, %v2450_v0  ;;  %1569 = vmatprep.mubr.msk.bf16.mxu1 %vm1668_vm0, %v2450_v0 }
  0x10   :  { %122 = vperm.xlu0 %1613, %v58_v14   ;;  %132 = vperm.xlu1 %1614, %v60_v15  }
  0x14   :  { %117 = vperm.xlu0 %1613, %v57_v18   ;;  %127 = vperm.xlu1 %1614, %v59_v19  }
  0x16   :  { %1542 = vmatmul.mubr.msk.bf16.gmra.mrb[4].mxu0 %vm285_vm2, %v1620_v10  ;;  %1570 = vmatmul.mubr.msk.bf16.gmra.mrb[4].mxu1 %vm285_vm2, %v1621_v11 }
  0x17   :  { %1545 = vmatprep.mubr.msk.bf16.mxu0 %vm1668_vm0, %v2450_v0  ;;  %1573 = vmatprep.mubr.msk.bf16.mxu1 %vm1668_vm0, %v2450_v0 }
  0x18   :  { %142 = vperm.xlu0 %1613, %v62_v20   ;;  %137 = vperm.xlu1 %1614, %v61_v21  }
  0x1c   :  { %152 = vperm.xlu0 %1613, %v64_v24   ;;  %147 = vperm.xlu1 %1614, %v63_v25  }
  0x1e   :  { %1546 = vmatmul.mubr.msk.bf16.gmra.mrb[8].mxu0 %vm285_vm2, %v1622_v16  ;;  %1574 = vmatmul.mubr.msk.bf16.gmra.mrb[8].mxu1 %vm285_vm2, %v1623_v17 }
  0x1f   :  { %1549 = vmatprep.mubr.msk.bf16.mxu0 %vm1668_vm0, %v2450_v0  ;;  %1577 = vmatprep.mubr.msk.bf16.mxu1 %vm1668_vm0, %v2450_v0 }
  0x20   :  { %82 = vperm.xlu0 %1613, %v50_v26   ;;  %92 = vperm.xlu1 %1614, %v52_v27  }
  0x24   :  { %102 = vperm.xlu0 %1613, %v54_v30   ;;  %112 = vperm.xlu1 %1614, %v56_v31   ;;  %v1897_v31 = vsub.s32 0, %v473_v58 }
  0x26   :  { %1550 = vmatmul.mubr.msk.bf16.gmra.mrb[12].mxu0 %vm285_vm2, %v1624_v22  ;;  %1578 = vmatmul.mubr.msk.bf16.gmra.mrb[12].mxu1 %vm285_vm2, %v1625_v23 }
  0x27   :  { %1553 = vmatprep.mubr.msk.bf16.mxu0 %vm1668_vm0, %v2450_v0  ;;  %1581 = vmatprep.mubr.msk.bf16.mxu1 %vm1668_vm0, %v2450_v0 }
  0x28   :  { %157 = vperm.xlu0 %1613, %v65_v32   ;;  %162 = vperm.xlu1 %1614, %v66_v33  }
  0x2c   :  { %167 = vperm.xlu0 %1613, %v67_v36   ;;  %172 = vperm.xlu1 %1614, %v68_v37  }
  0x2e   :  { %1554 = vmatmul.mubr.msk.bf16.gmra.mrb[16].mxu0 %vm285_vm2, %v1626_v28  ;;  %1582 = vmatmul.mubr.msk.bf16.gmra.mrb[16].mxu1 %vm285_vm2, %v1627_v29 }
  0x2f   :  { %1557 = vmatprep.mubr.msk.bf16.mxu0 %vm1668_vm0, %v2450_v0  ;;  %1585 = vmatprep.mubr.msk.bf16.mxu1 %vm1668_vm0, %v2450_v0 }
  0x30   :  { %177 = vperm.xlu0 %1613, %v69_v38   ;;  %182 = vperm.xlu1 %1614, %v70_v39  }
  0x34   :  { %187 = vperm.xlu0 %1613, %v71_v41   ;;  %192 = vperm.xlu1 %1614, %v72_v42  }
  0x36   :  { %1558 = vmatmul.mubr.msk.bf16.gmra.mrb[20].mxu0 %vm285_vm2, %v1628_v34  ;;  %1586 = vmatmul.mubr.msk.bf16.gmra.mrb[20].mxu1 %vm285_vm2, %v1629_v35 }
  0x37   :  { %1561 = vmatprep.mubr.msk.bf16.mxu0 %vm1668_vm0, %v2450_v0  ;;  %1599 = vmatprep.mubr.msk.bf16.mxu1 %vm1668_vm0, %v2450_v0 }
  0x38   :  { %197 = vperm.xlu0 %1613, %v73_v43   ;;  %202 = vperm.xlu1 %1614, %v74_v44  }
  0x3e   :  { %1562 = vmatmul.mubr.msk.bf16.gmra.mrb[24].mxu0 %vm285_vm2, %v1630_v40 }
  0x85   :  { %v78_v45 = vpop.permute.xlu0 %77  ;;  %v98_v47 = vpop.permute.xlu1 %97 }
  0x89   :  { %v88_v46 = vpop.permute.xlu0 %87  ;;  %v1872_v49 = vpop.permute.xlu1 %107 }
  0x8f   :  { %v1870_v48 = vpop.permute.xlu0 %122  ;;  %v1876_v51 = vpop.permute.xlu1 %132 }
  0x93   :  { %v1874_v50 = vpop.permute.xlu0 %117  ;;  %v1880_v53 = vpop.permute.xlu1 %127 }
  0x97   :  { %v1878_v52 = vpop.permute.xlu0 %142  ;;  %v1882_v60 = vpop.permute.xlu1 %137 }
  0x9b   :  { %v153_v59 = vpop.permute.xlu0 %152  ;;  %v148_v11 = vpop.permute.xlu1 %147 }
  0x9f   :  { %v83_v10 = vpop.permute.xlu0 %82  ;;  %v93_v32 = vpop.permute.xlu1 %92 }
  0xe1   :  { %v363_v61 = vpop.f32.mrb[0].mxu0  ;;  %v419_v62 = vpop.f32.mrb[0].mxu1 }
  0xe2   :  { %v364_v63 = vadd.f32 %v363_v61, %v78_v45  ;;  %v1539_v1 = vpop.f32.mrb[1].mxu0  ;;  %v1567_v2 = vpop.f32.mrb[1].mxu1  ;;  %v1904_v43 = vadd.f32 %v419_v62, %v148_v11 }
  0xe3   :  { %v366_v4 = vpop.f32.mrb[2].mxu0  ;;  %v422_v5 = vpop.f32.mrb[2].mxu1 }
  0xe4   :  { %v1540_v6 = vpop.f32.mrb[3].mxu0  ;;  %v1568_v7 = vpop.f32.mrb[3].mxu1  ;;  %v468_v8 = vcombine.high %v364_v63, %v364_v63  ;;  %v475_v9 = vrot.slane %v364_v63, %v1884_v3  ;;  %v367_v15 = vadd.f32 %v366_v4, %v83_v10  ;;  %v1906_v45 = vadd.f32 %v422_v5, %v153_v59 }
  0xe5   :  { %v103_v10 = vpop.permute.xlu0 %102 }
  0xe6   :  { %v482_v12 = vrot.slane %v468_v8, %v1884_v3  ;;  %v483_v18 = vcombine.high %v475_v9, %v475_v9  ;;  %v491_v25 = vrot.slane %v475_v9, %v1884_v3  ;;  %v523_v28 = vrot.slane %v367_v15, %v1884_v3 }
  0xe8   :  { %v484_v24 = vcombine.high %v482_v12, %v482_v12  ;;  %v498_v29 = vrot.slane %v482_v12, %v1884_v3  ;;  %v505_v30 = vrot.slane %v483_v18, %v1884_v3  ;;  %v513_v37 = vcombine.high %v491_v25, %v491_v25 }
  0xe9   :  { %v371_v13 = vpop.f32.mrb[4].mxu0  ;;  %v1888_v14 = vpop.f32.mrb[4].mxu1  ;;  %v530_v41 = vrot.slane %v523_v28, %v1884_v3  ;;  %v1909_v56 = vrot.slane %v491_v25, %v1897_v31 }
  0xea   :  { %2456 = vst [vmem:[#allocation3_spill] sm:$0xff] %v1888_v14  ;;  %v1543_v16 = vpop.f32.mrb[5].mxu0  ;;  %v1571_v17 = vpop.f32.mrb[5].mxu1  ;;  %v372_v19 = vadd.f32 %v371_v13, %v88_v46  ;;  %v512_v36 = vrot.slane %v484_v24, %v1884_v3  ;;  %v514_v54 = vcombine.high %v498_v29, %v498_v29  ;;  %v515_v55 = vcombine.high %v505_v30, %v505_v30 }
  0xeb   :  { %v374_v20 = vpop.f32.mrb[6].mxu0  ;;  %v1890_v21 = vpop.f32.mrb[6].mxu1  ;;  %v1915_v63 = vrot.slane %v505_v30, %v1897_v31  ;;  %v1920_v5 = vrot.slane %v513_v37, %v1897_v31  ;;  %v1925_v8 = vrot.slane %v498_v29, %v1897_v31  ;;  %v1928_v9 = vrot.slane %v530_v41, %v1897_v31 }
  0xec   :  { %2457 = vst [vmem:[#allocation4_spill] sm:$0xff] %v1890_v21  ;;  %v1544_v22 = vpop.f32.mrb[7].mxu0  ;;  %v1572_v23 = vpop.f32.mrb[7].mxu1  ;;  %v596_v26 = vcombine.high %v372_v19, %v372_v19  ;;  %v603_v27 = vrot.slane %v372_v19, %v1884_v3  ;;  %v375_v35 = vadd.f32 %v374_v20, %v93_v32  ;;  %v516_v4 = vcombine.high %v512_v36, %v512_v36 }
  0xed   :  { %v1933_v13 = vrot.slane %v515_v55, %v1897_v31  ;;  %v1936_v15 = vrot.slane %v512_v36, %v1897_v31  ;;  %v1939_v18 = vrot.slane %v514_v54, %v1897_v31 }
  0xee   :  { %v610_v33 = vrot.slane %v596_v26, %v1884_v3  ;;  %v611_v34 = vcombine.high %v603_v27, %v603_v27  ;;  %v619_v57 = vrot.slane %v603_v27, %v1884_v3  ;;  %v651_v62 = vrot.slane %v375_v35, %v1884_v3 }
  0xef   :  { %v1943_v23 = vrot.slane %v516_v4, %v1897_v31 }
  0xf0   :  { %v612_v38 = vcombine.high %v610_v33, %v610_v33  ;;  %v626_v6 = vrot.slane %v610_v33, %v1884_v3  ;;  %v641_v16 = vcombine.high %v619_v57, %v619_v57  ;;  %v658_v20 = vrot.slane %v651_v62, %v1884_v3  ;;  %v113_v62 = vpop.permute.xlu1 %112 }
  0xf1   :  { %v379_v39 = vpop.f32.mrb[8].mxu0  ;;  %v1901_v40 = vpop.f32.mrb[8].mxu1  ;;  %v1948_v29 = vrot.slane %v619_v57, %v1897_v31 }
  0xf2   :  { %2458 = vst [vmem:[#allocation5_spill] sm:$0xff] %v1901_v40  ;;  %v380_v42 = vadd.f32 %v379_v39, %v98_v47  ;;  %v1547_v44 = vpop.f32.mrb[9].mxu0  ;;  %v1575_v46 = vpop.f32.mrb[9].mxu1  ;;  %v633_v47 = vrot.slane %v611_v34, %v1884_v3  ;;  %v640_v7 = vrot.slane %v612_v38, %v1884_v3  ;;  %v642_v24 = vcombine.high %v626_v6, %v626_v6 }
  0xf3   :  { %v382_v58 = vpop.f32.mrb[10].mxu0  ;;  %v1912_v61 = vpop.f32.mrb[10].mxu1  ;;  %v1960_v36 = vrot.slane %v641_v16, %v1897_v31  ;;  %v1963_v37 = vrot.slane %v626_v6, %v1897_v31  ;;  %v1976_v54 = vrot.slane %v658_v20, %v1897_v31 }
  0xf4   :  { %2459 = vst [vmem:[#allocation6_spill] sm:$0xff] %v1912_v61  ;;  %v742_v59 = vcombine.high %v380_v42, %v380_v42  ;;  %v1548_v1 = vpop.f32.mrb[11].mxu0  ;;  %v1576_v2 = vpop.f32.mrb[11].mxu1  ;;  %v749_v11 = vrot.slane %v380_v42, %v1884_v3  ;;  %v383_v17 = vadd.f32 %v382_v58, %v103_v10  ;;  %v643_v19 = vcombine.high %v633_v47, %v633_v47 }
  0xf5   :  { %v644_v25 = vcombine.high %v640_v7, %v640_v7  ;;  %v1951_v30 = vrot.slane %v633_v47, %v1897_v31  ;;  %v1973_v46 = vrot.slane %v640_v7, %v1897_v31  ;;  %v1982_v47 = vrot.slane %v642_v24, %v1897_v31 }
  0xf6   :  { %v756_v12 = vrot.slane %v742_v59, %v1884_v3  ;;  %v757_v22 = vcombine.high %v749_v11, %v749_v11  ;;  %v1954_v32 = vrot.slane %v749_v11, %v1884_v3  ;;  %v797_v38 = vrot.slane %v383_v17, %v1884_v3 }
  0xf7   :  { %v1970_v44 = vrot.slane %v643_v19, %v1897_v31 }
  0xf8   :  { %v758_v26 = vcombine.high %v756_v12, %v756_v12  ;;  %v1957_v33 = vrot.slane %v756_v12, %v1884_v3  ;;  %v1979_v55 = vrot.slane %v757_v22, %v1884_v3  ;;  %v1997_v10 = vrot.slane %v1954_v32, %v1897_v31 }
  0xf9   :  { %v387_v27 = vpop.f32.mrb[12].mxu0  ;;  %v1945_v28 = vpop.f32.mrb[12].mxu1  ;;  %v2004_v12 = vrot.slane %v797_v38, %v1884_v3 }
  0xfa   :  { %2460 = vst [vmem:[#allocation7_spill] sm:$0xff] %v1945_v28  ;;  %v1551_v34 = vpop.f32.mrb[13].mxu0  ;;  %v1579_v35 = vpop.f32.mrb[13].mxu1  ;;  %v388_v39 = vadd.f32 %v387_v27, %v1872_v49  ;;  %v1985_v49 = vrot.slane %v644_v25, %v1897_v31  ;;  %v1988_v59 = vrot.slane %v758_v26, %v1884_v3  ;;  %v2001_v11 = vrot.slane %v1957_v33, %v1897_v31 }
  0xfb   :  { %v390_v41 = vpop.f32.mrb[14].mxu0  ;;  %v1967_v42 = vpop.f32.mrb[14].mxu1  ;;  %v2015_v25 = vrot.slane %v1979_v55, %v1897_v31 }
  0xfc   :  { %2461 = vst [vmem:[#allocation8_spill] sm:$0xff] %v1967_v42  ;;  %v1552_v57 = vpop.f32.mrb[15].mxu0  ;;  %v1580_v58 = vpop.f32.mrb[15].mxu1  ;;  %v888_v1 = vcombine.high %v388_v39, %v388_v39  ;;  %v895_v6 = vrot.slane %v388_v39, %v1884_v3  ;;  %v391_v7 = vadd.f32 %v390_v41, %v113_v62 }
  0xfe   :  { %v902_v16 = vrot.slane %v888_v1, %v1884_v3  ;;  %v903_v19 = vcombine.high %v895_v6, %v895_v6  ;;  %v911_v20 = vrot.slane %v895_v6, %v1884_v3  ;;  %v943_v22 = vrot.slane %v391_v7, %v1884_v3 }
 0x100   :  { %v904_v26 = vcombine.high %v902_v16, %v902_v16  ;;  %v918_v27 = vrot.slane %v902_v16, %v1884_v3  ;;  %v925_v38 = vrot.slane %v903_v19, %v1884_v3  ;;  %v933_v39 = vcombine.high %v911_v20, %v911_v20 }
 0x101   :  { %v395_v34 = vpop.f32.mrb[16].mxu0  ;;  %v2018_v35 = vpop.f32.mrb[16].mxu1  ;;  %v954_v41 = vrot.slane %v911_v20, %v1897_v31  ;;  %v950_v57 = vrot.slane %v943_v22, %v1884_v3 }
 0x102   :  { %2462 = vst [vmem:[#allocation9_spill] sm:$0xff] %v2018_v35  ;;  %v1555_v58 = vpop.f32.mrb[17].mxu0  ;;  %v1583_v62 = vpop.f32.mrb[17].mxu1  ;;  %v932_v1 = vrot.slane %v904_v26, %v1884_v3  ;;  %v934_v6 = vcombine.high %v918_v27, %v918_v27  ;;  %v970_v7 = vrot.slane %v918_v27, %v1897_v31  ;;  %v396_v0 = vadd.f32 %v395_v34, %v1874_v50 }
 0x103   :  { %v398_v16 = vpop.f32.mrb[18].mxu0  ;;  %v2026_v24 = vpop.f32.mrb[18].mxu1  ;;  %v935_v4 = vcombine.high %v925_v38, %v925_v38  ;;  %v958_v19 = vrot.slane %v925_v38, %v1897_v31  ;;  %v962_v17 = vrot.slane %v933_v39, %v1897_v31  ;;  %v2031_v20 = vmul.f32 %v954_v41, %v1904_v43 }
 0x104   :  { %2463 = vst [vmem:[#allocation10_spill] sm:$0xff] %v2026_v24  ;;  %v1556_v22 = vpop.f32.mrb[19].mxu0  ;;  %v1584_v58 = vpop.f32.mrb[19].mxu1  ;;  %v936_v62 = vcombine.high %v932_v1, %v932_v1  ;;  %v974_v26 = vrot.slane %v932_v1, %v1897_v31  ;;  %v978_v27 = vrot.slane %v934_v6, %v1897_v31  ;;  %v2036_v50 = vmul.f32 %v954_v41, %v1906_v45 }
 0x105   :  { %2464 = vst [vmem:[#allocation11_spill] sm:$0xff] %v2031_v20  ;;  %v966_v34 = vrot.slane %v935_v4, %v1897_v31  ;;  %v2040_v2 = vmul.f32 %v958_v19, %v1904_v43  ;;  %v2043_v38 = vmul.f32 %v958_v19, %v1906_v45  ;;  %v2046_v39 = vmul.f32 %v962_v17, %v1904_v43 }
 0x106   :  { %2465 = vst [vmem:[#allocation12_spill] sm:$0xff] %v2036_v50  ;;  %v982_v22 = vrot.slane %v936_v62, %v1897_v31  ;;  %v2050_v1 = vmul.f32 %v962_v17, %v1906_v45  ;;  %v2053_v6 = vmul.f32 %v970_v7, %v1904_v43  ;;  %v2056_v41 = vmul.f32 %v970_v7, %v1906_v45 }
 0x107   :  { %2466 = vst [vmem:[#allocation13_spill] sm:$0xff] %v2040_v2  ;;  %2467 = vst [vmem:[#allocation14_spill] sm:$0xff] %v2043_v38  ;;  %v2059_v4 = vmul.f32 %v966_v34, %v1904_v43  ;;  %v2062_v19 = vmul.f32 %v966_v34, %v1906_v45  ;;  %v2065_v58 = vmul.f32 %v974_v26, %v1904_v43 }
 0x108   :  { %2468 = vst [vmem:[#allocation15_spill] sm:$0xff] %v2046_v39  ;;  %2469 = vst [vmem:[#allocation16_spill] sm:$0xff] %v2050_v1  ;;  %v2068_v62 = vmul.f32 %v974_v26, %v1906_v45  ;;  %v2071_v17 = vmul.f32 %v978_v27, %v1904_v43  ;;  %v2074_v24 = vmul.f32 %v978_v27, %v1906_v45 }
 0x109   :  { %2470 = vst [vmem:[#allocation17_spill] sm:$0xff] %v2053_v6  ;;  %2471 = vst [vmem:[#allocation18_spill] sm:$0xff] %v2056_v41  ;;  %v2077_v7 = vmul.f32 %v982_v22, %v1904_v43  ;;  %v2080_v35 = vmul.f32 %v982_v22, %v1906_v45  ;;  %v403_v34 = vpop.f32.mrb[20].mxu0  ;;  %v2082_v42 = vpop.f32.mrb[20].mxu1  ;;  %v986_v28 = vrot.slane %v950_v57, %v1897_v31 }
 0x10a   :  { %2472 = vst [vmem:[#allocation19_spill] sm:$0xff] %v2059_v4  ;;  %2473 = vst [vmem:[#allocation20_spill] sm:$0xff] %v2062_v19  ;;  %v576_v26 = vmul.f32 %v1909_v56, %v396_v0  ;;  %v578_v61 = vmul.f32 %v1915_v63, %v396_v0  ;;  %v580_v40 = vmul.f32 %v1920_v5, %v396_v0  ;;  %v1559_v21 = vpop.f32.mrb[21].mxu0  ;;  %v1587_v27 = vpop.f32.mrb[21].mxu1 }
 0x10b   :  { %2474 = vst [vmem:[#allocation21_spill] sm:$0xff] %v2065_v58  ;;  %2475 = vst [vmem:[#allocation22_spill] sm:$0xff] %v2068_v62  ;;  %v582_v14 = vmul.f32 %v1933_v13, %v396_v0  ;;  %v584_v3 = vmul.f32 %v1925_v8, %v396_v0  ;;  %v586_v22 = vmul.f32 %v1936_v15, %v396_v0 }
 0x10c   :  { %2476 = vst [vmem:[#allocation23_spill] sm:$0xff] %v2071_v17  ;;  %2477 = vst [vmem:[#allocation24_spill] sm:$0xff] %v2074_v24  ;;  %v2095_v57 = vmul.f32 %v986_v28, %v1904_v43  ;;  %v2098_v24 = vmul.f32 %v986_v28, %v1906_v45  ;;  %v590_v21 = vmul.f32 %v1943_v23, %v396_v0 }
 0x10d   :  { %2478 = vst [vmem:[#allocation25_spill] sm:$0xff] %v2077_v7  ;;  %2479 = vst [vmem:[#allocation26_spill] sm:$0xff] %v2080_v35  ;;  %v588_v35 = vmul.f32 %v1939_v18, %v396_v0  ;;  %v406_v7 = vpop.f32.mrb[22].mxu0  ;;  %v592_v27 = vmul.f32 %v1928_v9, %v396_v0  ;;  %v2484_v58 = vcombine.high %v1954_v32, %v1954_v32 }
 0x10e   :  { %2480 = vst [vmem:[#allocation27_spill] sm:$0xff] %v2082_v42  ;;  %v2092_v42 = vpop.f32.mrb[22].mxu1  ;;  %2482 = vst [vmem:[#allocation29_spill] sm:$0xff] %v2095_v57  ;;  %v1560_v17 = vpop.f32.mrb[23].mxu0  ;;  %v399_v43 = vadd.f32 %v398_v16, %v1870_v48  ;;  %v404_v45 = vadd.f32 %v403_v34, %v1880_v53  ;;  %v2485_v0 = vcombine.high %v1979_v55, %v1979_v55 }
 0x10f   :  { %2481 = vst [vmem:[#allocation28_spill] sm:$0xff] %v2092_v42  ;;  %2483 = vst [vmem:[#allocation30_spill] sm:$0xff] %v2098_v24  ;;  %v1588_v62 = vpop.f32.mrb[23].mxu1  ;;  %v2106_v41 = vrot.slane %v2484_v58, %v1897_v31  ;;  %v2110_v42 = vrot.slane %v1988_v59, %v1897_v31  ;;  %v2486_v32 = vcombine.high %v1957_v33, %v1957_v33 }
 0x110   :  { %v2118_v28 = vrot.slane %v2485_v0, %v1897_v31  ;;  %v2128_v62 = vrot.slane %v2004_v12, %v1897_v31  ;;  %v407_v48 = vadd.f32 %v406_v7, %v1876_v51  ;;  %v577_v53 = vmul.f32 %v1909_v56, %v399_v43 }
 0x111   :  { %v2124_v58 = vrot.slane %v2486_v32, %v1897_v31  ;;  %v579_v16 = vmul.f32 %v1915_v63, %v399_v43  ;;  %v581_v55 = vmul.f32 %v1920_v5, %v399_v43  ;;  %v583_v17 = vmul.f32 %v1933_v13, %v399_v43  ;;  %v411_v7 = vpop.f32.mrb[24].mxu0 }
 0x112   :  { %2487 = vst [vmem:[#allocation31_spill] sm:$0xff] %v2128_v62  ;;  %v585_v34 = vmul.f32 %v1925_v8, %v399_v43  ;;  %v587_v33 = vmul.f32 %v1936_v15, %v399_v43  ;;  %v589_v0 = vmul.f32 %v1939_v18, %v399_v43  ;;  %v591_v32 = vmul.f32 %v1943_v23, %v399_v43  ;;  %v1563_v18 = vpop.f32.mrb[25].mxu0 }
 0x113   :  { %v593_v12 = vmul.f32 %v1928_v9, %v399_v43  ;;  %v704_v51 = vmul.f32 %v1948_v29, %v404_v45  ;;  %v706_v56 = vmul.f32 %v1951_v30, %v404_v45  ;;  %v708_v63 = vmul.f32 %v1960_v36, %v404_v45  ;;  %v414_v57 = vpop.f32.mrb[26].mxu0 }
 0x114   :  { %v710_v5 = vmul.f32 %v1970_v44, %v404_v45  ;;  %v712_v13 = vmul.f32 %v1963_v37, %v404_v45  ;;  %v714_v8 = vmul.f32 %v1973_v46, %v404_v45  ;;  %v716_v15 = vmul.f32 %v1982_v47, %v404_v45  ;;  %v1564_v6 = vpop.f32.mrb[27].mxu0 }
 0x115   :  { %v718_v23 = vmul.f32 %v1985_v49, %v404_v45  ;;  %v720_v9 = vmul.f32 %v1976_v54, %v404_v45  ;;  %v722_v43 = vadd.f32 %v704_v51, %v576_v26  ;;  %v724_v24 = vadd.f32 %v706_v56, %v578_v61  ;;  %v2491_v56 = vld [vmem:[#allocation13_spill] sm:$0xff] }
 0x116   :  { %v726_v19 = vadd.f32 %v708_v63, %v580_v40  ;;  %v728_v1 = vadd.f32 %v710_v5, %v582_v14  ;;  %v730_v38 = vadd.f32 %v712_v13, %v584_v3  ;;  %v732_v50 = vadd.f32 %v714_v8, %v586_v22  ;;  %v2493_v8 = vld [vmem:[#allocation19_spill] sm:$0xff] }
 0x117   :  { %v734_v4 = vadd.f32 %v716_v15, %v588_v35  ;;  %v2149_v39 = vadd.f32 %v718_v23, %v590_v21  ;;  %v705_v2 = vmul.f32 %v1948_v29, %v407_v48  ;;  %v707_v20 = vmul.f32 %v1951_v30, %v407_v48 }
 0x118   :  { %v709_v18 = vmul.f32 %v1960_v36, %v407_v48  ;;  %v711_v62 = vmul.f32 %v1970_v44, %v407_v48  ;;  %v713_v26 = vmul.f32 %v1963_v37, %v407_v48  ;;  %v715_v61 = vmul.f32 %v1973_v46, %v407_v48 }
 0x119   :  { %v717_v14 = vmul.f32 %v1982_v47, %v407_v48  ;;  %v719_v3 = vmul.f32 %v1985_v49, %v407_v48  ;;  %v721_v40 = vmul.f32 %v1976_v54, %v407_v48  ;;  %v723_v35 = vadd.f32 %v705_v2, %v577_v53 }
 0x11a   :  { %v725_v6 = vadd.f32 %v707_v20, %v579_v16  ;;  %v727_v22 = vadd.f32 %v709_v18, %v581_v55  ;;  %v729_v29 = vadd.f32 %v711_v62, %v583_v17  ;;  %v731_v21 = vadd.f32 %v713_v26, %v585_v34  ;;  %v2489_v16 = vld [vmem:[#allocation31_spill] sm:$0xff] }
 0x11b   :  { %v733_v30 = vadd.f32 %v715_v61, %v587_v33  ;;  %v735_v45 = vadd.f32 %v717_v14, %v589_v0  ;;  %v737_v36 = vadd.f32 %v719_v3, %v591_v32  ;;  %v412_v44 = vadd.f32 %v411_v7, %v1882_v60  ;;  %v2490_v32 = vld [vmem:[#allocation11_spill] sm:$0xff] }
 0x11c   :  { %v2488_v37 = vcombine.high %v1988_v59, %v1988_v59  ;;  %v415_v47 = vadd.f32 %v414_v57, %v1878_v52  ;;  %v738_v49 = vadd.f32 %v720_v9, %v592_v27  ;;  %v739_v51 = vadd.f32 %v721_v40, %v593_v12  ;;  %v2492_v7 = vld [vmem:[#allocation15_spill] sm:$0xff] }
 0x11d   :  { %v850_v54 = vmul.f32 %v1997_v10, %v412_v44  ;;  %v852_v2 = vmul.f32 %v2015_v25, %v412_v44  ;;  %v854_v20 = vmul.f32 %v2106_v41, %v412_v44  ;;  %v856_v62 = vmul.f32 %v2118_v28, %v412_v44 }
 0x11e   :  { %v836_v46 = vrot.slane %v2488_v37, %v1897_v31  ;;  %v858_v60 = vmul.f32 %v2001_v11, %v412_v44  ;;  %v860_v48 = vmul.f32 %v2110_v42, %v412_v44  ;;  %v862_v59 = vmul.f32 %v2124_v58, %v412_v44 }
 0x11f   :  { %v866_v52 = vmul.f32 %v2489_v16, %v412_v44  ;;  %v868_v57 = vadd.f32 %v850_v54, %v722_v43  ;;  %v870_v27 = vadd.f32 %v852_v2, %v724_v24  ;;  %v872_v55 = vadd.f32 %v854_v20, %v726_v19  ;;  %v2494_v24 = vld [vmem:[#allocation17_spill] sm:$0xff] }
 0x120   :  { %v864_v53 = vmul.f32 %v836_v46, %v412_v44  ;;  %v874_v17 = vadd.f32 %v856_v62, %v728_v1  ;;  %v876_v34 = vadd.f32 %v858_v60, %v730_v38  ;;  %v878_v33 = vadd.f32 %v860_v48, %v732_v50  ;;  %v2495_v44 = vld [vmem:[#allocation12_spill] sm:$0xff]  ;;  %v2500_v48 = vld [vmem:[#allocation21_spill] sm:$0xff] }
 0x121   :  { %v880_v0 = vadd.f32 %v862_v59, %v734_v4  ;;  %v2175_v12 = vadd.f32 %v2490_v32, %v868_v57  ;;  %v2178_v63 = vadd.f32 %v2491_v56, %v870_v27  ;;  %v2181_v5 = vadd.f32 %v2492_v7, %v872_v55  ;;  %v2502_v55 = vld [vmem:[#allocation23_spill] sm:$0xff] }
 0x122   :  { %v851_v13 = vmul.f32 %v1997_v10, %v415_v47  ;;  %v2185_v15 = vadd.f32 %v2493_v8, %v874_v17  ;;  %v2188_v19 = vadd.f32 %v2494_v24, %v876_v34  ;;  %v853_v50 = vmul.f32 %v2015_v25, %v415_v47  ;;  %v2503_v34 = vld [vmem:[#allocation24_spill] sm:$0xff] }
 0x123   :  { %v855_v38 = vmul.f32 %v2106_v41, %v415_v47  ;;  %v857_v1 = vmul.f32 %v2118_v28, %v415_v47  ;;  %v859_v4 = vmul.f32 %v2001_v11, %v415_v47  ;;  %v861_v23 = vmul.f32 %v2110_v42, %v415_v47  ;;  %v2496_v28 = vld [vmem:[#allocation14_spill] sm:$0xff]  ;;  %v2497_v11 = vld [vmem:[#allocation16_spill] sm:$0xff] }
 0x124   :  { %v863_v9 = vmul.f32 %v2124_v58, %v415_v47  ;;  %v865_v43 = vmul.f32 %v836_v46, %v415_v47  ;;  %v867_v10 = vmul.f32 %v2489_v16, %v415_v47  ;;  %v869_v18 = vadd.f32 %v851_v13, %v723_v35  ;;  %v2498_v46 = vld [vmem:[#allocation20_spill] sm:$0xff]  ;;  %v2499_v35 = vld [vmem:[#allocation18_spill] sm:$0xff] }
 0x125   :  { %v871_v26 = vadd.f32 %v853_v50, %v725_v6  ;;  %v873_v61 = vadd.f32 %v855_v38, %v727_v22  ;;  %v875_v14 = vadd.f32 %v857_v1, %v729_v29  ;;  %v877_v3 = vadd.f32 %v859_v4, %v731_v21  ;;  %v2501_v16 = vld [vmem:[#allocation22_spill] sm:$0xff]  ;;  %v2506_v4 = vld [vmem:[#allocation29_spill] sm:$0xff] }
 0x126   :  { %v879_v40 = vadd.f32 %v861_v23, %v733_v30  ;;  %v881_v25 = vadd.f32 %v863_v9, %v735_v45  ;;  %v2198_v41 = vadd.f32 %v2495_v44, %v869_v18  ;;  %v882_v42 = vadd.f32 %v864_v53, %v2149_v39  ;;  %v2505_v38 = vld [vmem:[#allocation26_spill] sm:$0xff] }
 0x127   :  { %v2201_v37 = vadd.f32 %v2496_v28, %v871_v26  ;;  %v2205_v58 = vadd.f32 %v2497_v11, %v873_v61  ;;  %v2208_v47 = vadd.f32 %v2498_v46, %v875_v14  ;;  %v2211_v6 = vadd.f32 %v2499_v35, %v877_v3 }
 0x128   :  { %v883_v22 = vadd.f32 %v865_v43, %v737_v36  ;;  %v1033_v29 = vsel %vm1032_vm3, %v2198_v41, -inf  ;;  %v884_v30 = vadd.f32 %v866_v52, %v738_v49  ;;  %v885_v45 = vadd.f32 %v867_v10, %v739_v51  ;;  %v2507_v10 = vld [vmem:[#allocation30_spill] sm:$0xff] }
 0x129   :  { %v1041_v21 = vsel %vm1032_vm3, %v2201_v37, -inf  ;;  %v1034_v39 = vmax.f32 %v2175_v12, %v1033_v29  ;;  %v1049_v2 = vsel %vm1032_vm3, %v2205_v58, -inf  ;;  %v1057_v20 = vsel %vm1032_vm3, %v2208_v47, -inf }
 0x12a   :  { %v1042_v54 = vmax.f32 %v2178_v63, %v1041_v21  ;;  %v1050_v36 = vmax.f32 %v2181_v5, %v1049_v2  ;;  %v1058_v62 = vmax.f32 %v2185_v15, %v1057_v20  ;;  %v1065_v60 = vsel %vm1032_vm3, %v2211_v6, -inf }
 0x12b   :  { %v2228_v49 = vadd.f32 %v2500_v48, %v878_v33  ;;  %v1035_v51 = vrot.slane %v1034_v39, 4  ;;  %v1066_v53 = vmax.f32 %v2188_v19, %v1065_v60  ;;  %v2232_v52 = vadd.f32 %v2501_v16, %v879_v40  ;;  %v2504_v33 = vld [vmem:[#allocation25_spill] sm:$0xff] }
 0x12c   :  { %v1043_v59 = vrot.slane %v1042_v54, 4  ;;  %v1051_v57 = vrot.slane %v1050_v36, 4  ;;  %v1059_v27 = vrot.slane %v1058_v62, 4  ;;  %v2235_v17 = vadd.f32 %v2502_v55, %v880_v0 }
 0x12d   :  { %v2238_v32 = vadd.f32 %v2503_v34, %v881_v25  ;;  %v1036_v56 = vmax.f32 %v1034_v39, %v1035_v51  ;;  %v1067_v13 = vrot.slane %v1066_v53, 4  ;;  %v2241_v8 = vadd.f32 %v2504_v33, %v882_v42 }
 0x12e   :  { %v1044_v7 = vmax.f32 %v1042_v54, %v1043_v59  ;;  %v1052_v24 = vmax.f32 %v1050_v36, %v1051_v57  ;;  %v1060_v50 = vmax.f32 %v1058_v62, %v1059_v27  ;;  %v2244_v1 = vadd.f32 %v2505_v38, %v883_v22 }
 0x12f   :  { %v2247_v23 = vadd.f32 %v2506_v4, %v884_v30  ;;  %v1037_v9 = vrot.slane %v1036_v56, 2  ;;  %v1068_v43 = vmax.f32 %v1066_v53, %v1067_v13  ;;  %v2250_v18 = vadd.f32 %v2507_v10, %v885_v45 }
 0x130   :  { %v1045_v0 = vrot.slane %v1044_v7, 2  ;;  %v1053_v26 = vrot.slane %v1052_v24, 2  ;;  %v1061_v61 = vrot.slane %v1060_v50, 2  ;;  %v1073_v14 = vsel %vm1032_vm3, %v2232_v52, -inf }
 0x131   :  { %v1081_v3 = vsel %vm1032_vm3, %v2238_v32, -inf  ;;  %v1038_v40 = vmax.f32 %v1036_v56, %v1037_v9  ;;  %v1069_v44 = vrot.slane %v1068_v43, 2  ;;  %v1074_v28 = vmax.f32 %v2228_v49, %v1073_v14 }
 0x132   :  { %v1046_v25 = vmax.f32 %v1044_v7, %v1045_v0  ;;  %v1054_v42 = vmax.f32 %v1052_v24, %v1053_v26  ;;  %v1062_v11 = vmax.f32 %v1060_v50, %v1061_v61  ;;  %v1082_v46 = vmax.f32 %v2235_v17, %v1081_v3 }
 0x133   :  { %v1089_v35 = vsel %vm1032_vm3, %v2244_v1, -inf  ;;  %v1039_v22 = vrot.slane %v1038_v40, 1  ;;  %v1070_v21 = vmax.f32 %v1068_v43, %v1069_v44  ;;  %v1075_v30 = vrot.slane %v1074_v28, 4 }
 0x134   :  { %v1047_v29 = vrot.slane %v1046_v25, 1  ;;  %v1055_v45 = vrot.slane %v1054_v42, 1  ;;  %v1063_v39 = vrot.slane %v1062_v11, 1  ;;  %v1083_v54 = vrot.slane %v1082_v46, 4 }
 0x135   :  { %v1090_v2 = vmax.f32 %v2241_v8, %v1089_v35  ;;  %v1040_v20 = vmax.f32 %v1038_v40, %v1039_v22  ;;  %v1071_v62 = vrot.slane %v1070_v21, 1  ;;  %v1076_v60 = vmax.f32 %v1074_v28, %v1075_v30 }
 0x136   :  { %v1048_v36 = vmax.f32 %v1046_v25, %v1047_v29  ;;  %v1056_v48 = vmax.f32 %v1054_v42, %v1055_v45  ;;  %v1064_v51 = vmax.f32 %v1062_v11, %v1063_v39  ;;  %v1084_v59 = vmax.f32 %v1082_v46, %v1083_v54 }
 0x137   :  { %v1091_v53 = vrot.slane %v1090_v2, 4  ;;  %v1106_v16 = vsub.f32 %v2198_v41, %v1040_v20  ;;  %v1072_v27 = vmax.f32 %v1070_v21, %v1071_v62  ;;  %v1077_v55 = vrot.slane %v1076_v60, 2 }
 0x138   :  { %v1108_v57 = vsub.f32 %v2201_v37, %v1048_v36  ;;  %v1110_v34 = vsub.f32 %v2205_v58, %v1056_v48  ;;  %v1085_v56 = vrot.slane %v1084_v59, 2  ;;  %v1097_v13 = vsel %vm1032_vm3, %v2250_v18, -inf }
 0x139   :  { %v1092_v7 = vmax.f32 %v1090_v2, %v1091_v53  ;;  %v1078_v33 = vmax.f32 %v1076_v60, %v1077_v55  ;;  %v1098_v24 = vmax.f32 %v2247_v23, %v1097_v13  ;;  %v1105_v50 = vsub.f32 %v2175_v12, %v1040_v20 }
 0x13a   :  { %v1107_v38 = vsub.f32 %v2178_v63, %v1048_v36  ;;  %v1086_v4 = vmax.f32 %v1084_v59, %v1085_v56  ;;  %v1109_v37 = vsub.f32 %v2181_v5, %v1056_v48  ;;  %v1111_v9 = vsub.f32 %v2185_v15, %v1064_v51 }
 0x13b   :  { %v1093_v41 = vrot.slane %v1092_v7, 2  ;;  %v1079_v0 = vrot.slane %v1078_v33, 1  ;;  %v1099_v58 = vrot.slane %v1098_v24, 4  ;;  %v1112_v43 = vsub.f32 %v2208_v47, %v1064_v51 }
 0x13c   :  { %v1113_v10 = vsub.f32 %v2188_v19, %v1072_v27  ;;  %v1087_v26 = vrot.slane %v1086_v4, 1  ;;  %v1114_v14 = vsub.f32 %v2211_v6, %v1072_v27  ;;  %v1123_v3 = vpack.c.bf16 %v1106_v16, %v1105_v50 }
 0x13d   :  { %v1094_v61 = vmax.f32 %v1092_v7, %v1093_v41  ;;  %v1080_v12 = vmax.f32 %v1078_v33, %v1079_v0  ;;  %v1100_v40 = vmax.f32 %v1098_v24, %v1099_v58  ;;  %v1124_v63 = vpack.c.bf16 %v1108_v57, %v1107_v38 }
 0x13e   :  { %v1125_v25 = vpack.c.bf16 %v1110_v34, %v1109_v37  ;;  %v1088_v44 = vmax.f32 %v1086_v4, %v1087_v26  ;;  %v1126_v5 = vpack.c.bf16 %v1112_v43, %v1111_v9  ;;  %v1127_v42 = vpack.c.bf16 %v1114_v14, %v1113_v10 }
 0x13f   :  { %v1095_v28 = vrot.slane %v1094_v61, 1  ;;  %v1101_v15 = vrot.slane %v1100_v40, 2  ;;  %v1115_v11 = vsub.f32 %v2228_v49, %v1080_v12  ;;  %v1116_v47 = vsub.f32 %v2232_v52, %v1080_v12 }
 0x140   :  { %v1133_v46 = vmul.bf16 1069105081, %v1123_v3  ;;  %v1117_v35 = vsub.f32 %v2235_v17, %v1088_v44  ;;  %v1118_v6 = vsub.f32 %v2238_v32, %v1088_v44  ;;  %v1136_v22 = vmul.bf16 1069105081, %v1124_v63 }
 0x141   :  { %v1096_v19 = vmax.f32 %v1094_v61, %v1095_v28  ;;  %v1102_v29 = vmax.f32 %v1100_v40, %v1101_v15  ;;  %v1128_v21 = vpack.c.bf16 %v1116_v47, %v1115_v11  ;;  %v1139_v30 = vmul.bf16 1069105081, %v1125_v25 }
 0x142   :  { %1631 = vpow.bf16 %v1133_v46  ;;  %v1129_v54 = vpack.c.bf16 %v1118_v6, %v1117_v35  ;;  %v1142_v52 = vmul.bf16 1069105081, %v1126_v5  ;;  %v1145_v2 = vmul.bf16 1069105081, %v1127_v42 }
 0x143   :  { %v1119_v45 = vsub.f32 %v2241_v8, %v1096_v19  ;;  %v1120_v39 = vsub.f32 %v2244_v1, %v1096_v19  ;;  %1633 = vpow.bf16 %v1136_v22  ;;  %v1103_v49 = vrot.slane %v1102_v29, 1 }
 0x144   :  { %1635 = vpow.bf16 %v1139_v30  ;;  %v1148_v36 = vmul.bf16 1069105081, %v1128_v21  ;;  %v1151_v17 = vmul.bf16 1069105081, %v1129_v54 }
 0x145   :  { %v1130_v20 = vpack.c.bf16 %v1120_v39, %v1119_v45  ;;  %v1104_v62 = vmax.f32 %v1102_v29, %v1103_v49  ;;  %1637 = vpow.bf16 %v1142_v52 }
 0x146   :  { %1639 = vpow.bf16 %v1145_v2 }
 0x147   :  { %v1154_v32 = vmul.bf16 1069105081, %v1130_v20  ;;  %v1121_v60 = vsub.f32 %v2247_v23, %v1104_v62  ;;  %v1122_v48 = vsub.f32 %v2250_v18, %v1104_v62  ;;  %1641 = vpow.bf16 %v1148_v36 }
 0x148   :  { %1643 = vpow.bf16 %v1151_v17 }
 0x149   :  { %v1131_v8 = vpack.c.bf16 %v1122_v48, %v1121_v60  ;;  %1645 = vpow.bf16 %v1154_v32 }
 0x14b   :  { %v1157_v1 = vmul.bf16 1069105081, %v1131_v8 }
 0x14d   :  { %v2282_v51 = vpop.eup %1631  ;;  %1647 = vpow.bf16 %v1157_v1 }
 0x14e   :  { %v2284_v59 = vpop.eup %1633  ;;  %v1159_v53 = vunpack.c.l.bf16 %v2282_v51  ;;  %v1160_v16 = vunpack.c.h.bf16 %v2282_v51 }
 0x14f   :  { %v2288_v57 = vpop.eup %1635  ;;  %v1161_v23 = vunpack.c.l.bf16 %v2284_v59  ;;  %v1162_v18 = vunpack.c.h.bf16 %v2284_v59 }
 0x150   :  { %v1163_v27 = vunpack.c.l.bf16 %v2288_v57  ;;  %v1164_v55 = vunpack.c.h.bf16 %v2288_v57  ;;  %v1177_v34 = vsel %vm1032_vm3, %v1160_v16, 0.0  ;;  %v2297_v56 = vpop.eup %1637 }
 0x151   :  { %v1178_v7 = vadd.f32 %v1177_v34, %v1159_v53  ;;  %v1185_v13 = vsel %vm1032_vm3, %v1162_v18, 0.0  ;;  %v2304_v33 = vpop.eup %1639  ;;  %v1165_v24 = vunpack.c.l.bf16 %v2297_v56  ;;  %v1166_v50 = vunpack.c.h.bf16 %v2297_v56 }
 0x152   :  { %v1186_v38 = vadd.f32 %v1185_v13, %v1161_v23  ;;  %v1193_v4 = vsel %vm1032_vm3, %v1164_v55, 0.0  ;;  %v2313_v41 = vpop.eup %1641  ;;  %v1167_v37 = vunpack.c.l.bf16 %v2304_v33  ;;  %v1168_v9 = vunpack.c.h.bf16 %v2304_v33 }
 0x153   :  { %v1179_v0 = vrot.slane %v1178_v7, 4  ;;  %v1194_v58 = vadd.f32 %v1193_v4, %v1163_v27  ;;  %v2319_v43 = vpop.eup %1643  ;;  %v1169_v10 = vunpack.c.l.bf16 %v2313_v41  ;;  %v1170_v26 = vunpack.c.h.bf16 %v2313_v41 }
 0x154   :  { %v1187_v61 = vrot.slane %v1186_v38, 4  ;;  %v1201_v14 = vsel %vm1032_vm3, %v1166_v50, 0.0  ;;  %v2326_v3 = vpop.eup %1645  ;;  %v1171_v12 = vunpack.c.l.bf16 %v2319_v43  ;;  %v1172_v40 = vunpack.c.h.bf16 %v2319_v43 }
 0x155   :  { %v1180_v63 = vadd.f32 %v1179_v0, %v1178_v7  ;;  %v1195_v25 = vrot.slane %v1194_v58, 4  ;;  %v1173_v44 = vunpack.c.l.bf16 %v2326_v3  ;;  %v1174_v28 = vunpack.c.h.bf16 %v2326_v3 }
 0x156   :  { %v1188_v5 = vadd.f32 %v1187_v61, %v1186_v38  ;;  %v1202_v42 = vadd.f32 %v1201_v14, %v1165_v24  ;;  %v1209_v47 = vsel %vm1032_vm3, %v1168_v9, 0.0  ;;  %v1217_v46 = vsel %vm1032_vm3, %v1170_v26, 0.0 }
 0x157   :  { %v1181_v15 = vrot.slane %v1180_v63, 2  ;;  %v1196_v11 = vadd.f32 %v1195_v25, %v1194_v58  ;;  %v1210_v6 = vadd.f32 %v1209_v47, %v1167_v37  ;;  %v1218_v22 = vadd.f32 %v1217_v46, %v1169_v10 }
 0x158   :  { %v1189_v19 = vrot.slane %v1188_v5, 2  ;;  %v1203_v35 = vrot.slane %v1202_v42, 4  ;;  %v2344_v29 = vpop.eup %1647  ;;  %v1225_v45 = vsel %vm1032_vm3, %v1172_v40, 0.0  ;;  %v1233_v39 = vsel %vm1032_vm3, %v1174_v28, 0.0 }
 0x159   :  { %v1182_v21 = vadd.f32 %v1181_v15, %v1180_v63  ;;  %v1197_v30 = vrot.slane %v1196_v11, 2  ;;  %v1175_v54 = vunpack.c.l.bf16 %v2344_v29  ;;  %v1176_v49 = vunpack.c.h.bf16 %v2344_v29 }
 0x15a   :  { %v1190_v52 = vadd.f32 %v1189_v19, %v1188_v5  ;;  %v1204_v2 = vadd.f32 %v1203_v35, %v1202_v42  ;;  %v1211_v17 = vrot.slane %v1210_v6, 4  ;;  %v1219_v62 = vrot.slane %v1218_v22, 4 }
 0x15b   :  { %v1183_v20 = vrot.slane %v1182_v21, 1  ;;  %v1198_v36 = vadd.f32 %v1197_v30, %v1196_v11  ;;  %v1226_v48 = vadd.f32 %v1225_v45, %v1171_v12  ;;  %v1234_v8 = vadd.f32 %v1233_v39, %v1173_v44 }
 0x15c   :  { %v1191_v32 = vrot.slane %v1190_v52, 1  ;;  %v1205_v60 = vrot.slane %v1204_v2, 2  ;;  %v1212_v7 = vadd.f32 %v1211_v17, %v1210_v6  ;;  %v1220_v13 = vadd.f32 %v1219_v62, %v1218_v22 }
 0x15d   :  { %v1184_v1 = vadd.f32 %v1183_v20, %v1182_v21  ;;  %v1199_v34 = vrot.slane %v1198_v36, 1  ;;  %v1227_v0 = vrot.slane %v1226_v48, 4  ;;  %v1235_v58 = vrot.slane %v1234_v8, 4 }
 0x15e   :  { %v1192_v38 = vadd.f32 %v1191_v32, %v1190_v52  ;;  %v1206_v4 = vadd.f32 %v1205_v60, %v1204_v2  ;;  %v1213_v14 = vrot.slane %v1212_v7, 2  ;;  %v1221_v63 = vrot.slane %v1220_v13, 2 }
 0x15f   :  { %v1200_v61 = vadd.f32 %v1199_v34, %v1198_v36  ;;  %v1241_v25 = vsel %vm1032_vm3, %v1176_v49, 0.0  ;;  %v1228_v42 = vadd.f32 %v1227_v0, %v1226_v48  ;;  %v1236_v15 = vadd.f32 %v1235_v58, %v1234_v8  ;;  %v158_v34 = vpop.permute.xlu0 %157 }
 0x160   :  { %v1207_v5 = vrot.slane %v1206_v4, 1  ;;  %v1242_v11 = vadd.f32 %v1241_v25, %v1175_v54  ;;  %v1214_v47 = vadd.f32 %v1213_v14, %v1212_v7  ;;  %v1222_v46 = vadd.f32 %v1221_v63, %v1220_v13 }
 0x161   :  { %1649 = vrcp.f32 %v1184_v1  ;;  %v1229_v35 = vrot.slane %v1228_v42, 2  ;;  %v1237_v6 = vrot.slane %v1236_v15, 2 }
 0x162   :  { %v1208_v19 = vadd.f32 %v1207_v5, %v1206_v4  ;;  %v1243_v22 = vrot.slane %v1242_v11, 4  ;;  %v1215_v21 = vrot.slane %v1214_v47, 1  ;;  %v1223_v30 = vrot.slane %v1222_v46, 1 }
 0x163   :  { %1651 = vrcp.f32 %v1192_v38  ;;  %v1230_v45 = vadd.f32 %v1229_v35, %v1228_v42  ;;  %v1238_v39 = vadd.f32 %v1237_v6, %v1236_v15  ;;  %v168_v59 = vpop.permute.xlu0 %167 }
 0x164   :  { %v1244_v52 = vadd.f32 %v1243_v22, %v1242_v11  ;;  %1653 = vrcp.f32 %v1200_v61  ;;  %v1216_v2 = vadd.f32 %v1215_v21, %v1214_v47  ;;  %v1224_v20 = vadd.f32 %v1223_v30, %v1222_v46 }
 0x165   :  { %1655 = vrcp.f32 %v1208_v19  ;;  %v1231_v36 = vrot.slane %v1230_v45, 1  ;;  %v1239_v17 = vrot.slane %v1238_v39, 1 }
 0x166   :  { %v1245_v62 = vrot.slane %v1244_v52, 2  ;;  %1657 = vrcp.f32 %v1216_v2 }
 0x167   :  { %v1232_v32 = vadd.f32 %v1231_v36, %v1230_v45  ;;  %v1240_v60 = vadd.f32 %v1239_v17, %v1238_v39  ;;  %1659 = vrcp.f32 %v1224_v20  ;;  %v178_v45 = vpop.permute.xlu0 %177 }
 0x168   :  { %v1246_v48 = vadd.f32 %v1245_v62, %v1244_v52 }
 0x169   :  { %1661 = vrcp.f32 %v1232_v32 }
 0x16a   :  { %v1247_v8 = vrot.slane %v1246_v48, 1  ;;  %1663 = vrcp.f32 %v1240_v60 }
 0x16b   :  { %v1650_v1 = vpop.eup %1649  ;;  %v188_v60 = vpop.permute.xlu0 %187 }
 0x16c   :  { %v1248_v7 = vadd.f32 %v1247_v8, %v1246_v48  ;;  %v1258_v13 = vmul.f32 %v1650_v1, %v1159_v53  ;;  %v1259_v38 = vmul.f32 %v1650_v1, %v1160_v16  ;;  %v2508_v8 = vld [vmem:[#allocation2_spill] sm:$0xff] }
 0x16d   :  { %v1652_v4 = vpop.eup %1651 }
 0x16e   :  { %v1654_v0 = vpop.eup %1653  ;;  %1665 = vrcp.f32 %v1248_v7  ;;  %v1260_v58 = vmul.f32 %v1652_v4, %v1161_v23  ;;  %v1261_v61 = vmul.f32 %v1652_v4, %v1162_v18  ;;  %v1284_v14 = vsel %vm1032_vm3, %v1259_v38, 0.0  ;;  %v2510_v4 = vld [vmem:[#allocation4_spill] sm:$0xff] }
 0x16f   :  { %v1656_v63 = vpop.eup %1655  ;;  %v1263_v25 = vmul.f32 %v1654_v0, %v1164_v55  ;;  %v1262_v53 = vmul.f32 %v1654_v0, %v1163_v27 }
 0x170   :  { %v1276_v51 = vadd.f32 %v1260_v58, %v1258_v13  ;;  %v1265_v16 = vmul.f32 %v1656_v63, %v1166_v50  ;;  %v1285_v5 = vsel %vm1032_vm3, %v1261_v61, 0.0  ;;  %v1658_v42 = vpop.eup %1657  ;;  %v1264_v18 = vmul.f32 %v1656_v63, %v1165_v24  ;;  %v2511_v61 = vld [vmem:[#allocation5_spill] sm:$0xff]  ;;  %v2512_v63 = vld [vmem:[#allocation6_spill] sm:$0xff] }
 0x171   :  { %v1286_v23 = vadd.f32 %v1285_v5, %v1284_v14  ;;  %v1660_v15 = vpop.eup %1659  ;;  %v1267_v55 = vmul.f32 %v1658_v42, %v1168_v9  ;;  %v1287_v57 = vsel %vm1032_vm3, %v1263_v25, 0.0  ;;  %v1266_v50 = vmul.f32 %v1658_v42, %v1167_v37  ;;  %v163_v37 = vpop.permute.xlu1 %162 }
 0x172   :  { %v1277_v11 = vadd.f32 %v1276_v51, %v1262_v53  ;;  %v1269_v19 = vmul.f32 %v1660_v15, %v1170_v26  ;;  %v1289_v35 = vsel %vm1032_vm3, %v1265_v16, 0.0  ;;  %v1268_v24 = vmul.f32 %v1660_v15, %v1169_v10  ;;  %v2513_v53 = vld [vmem:[#allocation7_spill] sm:$0xff]  ;;  %v198_v42 = vpop.permute.xlu0 %197 }
 0x173   :  { %v1288_v27 = vadd.f32 %v1287_v57, %v1286_v23  ;;  %v1662_v47 = vpop.eup %1661  ;;  %v1291_v21 = vsel %vm1032_vm3, %v1267_v55, 0.0  ;;  %v431_v29 = vadd.f32 %v2510_v4, %v163_v37  ;;  %v436_v14 = vadd.f32 %v2511_v61, %v168_v59  ;;  %v2515_v57 = vld [vmem:[#allocation27_spill] sm:$0xff] }
 0x174   :  { %v1278_v46 = vadd.f32 %v1277_v11, %v1264_v18  ;;  %v1664_v6 = vpop.eup %1663  ;;  %v1271_v9 = vmul.f32 %v1662_v47, %v1172_v40  ;;  %v1270_v26 = vmul.f32 %v1662_v47, %v1171_v12  ;;  %v1293_v41 = vsel %vm1032_vm3, %v1269_v19, 0.0  ;;  %v2514_v11 = vld [vmem:[#allocation8_spill] sm:$0xff] }
 0x175   :  { %v1290_v56 = vadd.f32 %v1289_v35, %v1288_v27  ;;  %v1273_v52 = vmul.f32 %v1664_v6, %v1174_v28  ;;  %v1272_v2 = vmul.f32 %v1664_v6, %v1173_v44  ;;  %v173_v32 = vpop.permute.xlu1 %172  ;;  %v444_v51 = vadd.f32 %v2513_v53, %v178_v45 }
 0x176   :  { %v1279_v22 = vadd.f32 %v1278_v46, %v1266_v50  ;;  %v1295_v36 = vsel %vm1032_vm3, %v1271_v9, 0.0  ;;  %v439_v25 = vadd.f32 %v2512_v63, %v173_v32  ;;  %v460_v27 = vadd.f32 %v2515_v57, %v198_v42  ;;  %v2516_v9 = vld [vmem:[#allocation9_spill] sm:$0xff] }
 0x177   :  { %v1292_v30 = vadd.f32 %v1291_v21, %v1290_v56  ;;  %v1297_v62 = vsel %vm1032_vm3, %v1273_v52, 0.0  ;;  %v452_v21 = vadd.f32 %v2516_v9, %v188_v60 }
 0x178   :  { %v1666_v33 = vpop.eup %1665  ;;  %v1280_v39 = vadd.f32 %v1279_v22, %v1268_v24 }
 0x179   :  { %v1294_v10 = vadd.f32 %v1293_v41, %v1292_v30  ;;  %v1275_v20 = vmul.f32 %v1666_v33, %v1176_v49  ;;  %v1274_v43 = vmul.f32 %v1666_v33, %v1175_v54  ;;  %v2509_v49 = vld [vmem:[#allocation3_spill] sm:$0xff]  ;;  %v183_v5 = vpop.permute.xlu1 %182 }
 0x17a   :  { %v1281_v40 = vadd.f32 %v1280_v39, %v1270_v26  ;;  %v428_v13 = vadd.f32 %v2509_v49, %v158_v34  ;;  %v447_v55 = vadd.f32 %v2514_v11, %v183_v5 }
 0x17b   :  { %v1296_v17 = vadd.f32 %v1295_v36, %v1294_v10  ;;  %v1299_v3 = vsel %vm1032_vm3, %v1275_v20, 0.0 }
 0x17c   :  { %v1282_v12 = vadd.f32 %v1281_v40, %v1272_v2  ;;  %v2517_v40 = vld [vmem:[#allocation10_spill] sm:$0xff] }
 0x17d   :  { %v1298_v28 = vadd.f32 %v1297_v62, %v1296_v17  ;;  %v193_v41 = vpop.permute.xlu1 %192  ;;  %v2518_v62 = vmov 0.0  }
 0x17e   :  { %v1283_v48 = vadd.f32 %v1282_v12, %v1274_v43  ;;  %v455_v20 = vadd.f32 %v2517_v40, %v193_v41 }
 0x17f   :  { %v1300_v44 = vadd.f32 %v1299_v3, %v1298_v28  ;;  %v1425_v3 = vld [vmem:[%s2448_s3] sm:$0xf] }
 0x180   :  { %v1310_v1 = vrot.slane %v1283_v48, %v2508_v8  ;;  %v1303_v7 = vcombine.high %v1283_v48, %v1283_v48 }
 0x181   :  { %v1358_v38 = vrot.slane %v1300_v44, %v2508_v8  ;;  %v203_v44 = vpop.permute.xlu1 %202 }
 0x182   :  { %v1318_v54 = vcombine.high %v1310_v1, %v1310_v1  ;;  %v1326_v0 = vrot.slane %v1310_v1, %v2508_v8  ;;  %v1317_v58 = vrot.slane %v1303_v7, %v2508_v8 }
 0x183   :  { %v1365_v16 = vrot.slane %v1358_v38, %v2508_v8 }
 0x184   :  { %v1340_v34 = vrot.slane %v1318_v54, %v2508_v8  ;;  %v1369_v23 = vrot.slane %v1326_v0, %v1897_v31  ;;  %v1348_v15 = vcombine.high %v1326_v0, %v1326_v0  ;;  %v1319_v18 = vcombine.high %v1317_v58, %v1317_v58 }
 0x185   :  { %v1333_v59 = vrot.slane %v1317_v58, %v2508_v8  ;;  %v1401_v47 = vrot.slane %v1365_v16, %v1897_v31 }
 0x186   :  { %v1373_v50 = vrot.slane %v1340_v34, %v1897_v31  ;;  %v1411_v46 = vmul.f32 %v1369_v23, %v428_v13  ;;  %v1350_v19 = vcombine.high %v1340_v34, %v1340_v34  ;;  %v1377_v35 = vrot.slane %v1348_v15, %v1897_v31 }
 0x187   :  { %v1347_v6 = vrot.slane %v1319_v18, %v2508_v8  ;;  %v1385_v56 = vrot.slane %v1333_v59, %v1897_v31  ;;  %v1349_v24 = vcombine.high %v1333_v59, %v1333_v59  ;;  %v1419_v22 = vmul.f32 %v1401_v47, %v460_v27  ;;  %v2519_v8 = vld [vmem:[#allocation28_spill] sm:$0xff] }
 0x188   :  { %v1412_v30 = vmul.f32 %v1373_v50, %v431_v29  ;;  %v1381_v33 = vrot.slane %v1350_v19, %v1897_v31  ;;  %v1413_v37 = vmul.f32 %v1377_v35, %v436_v14  ;;  %v463_v1 = vadd.f32 %v2519_v8, %v203_v44 }
 0x189   :  { %v1389_v45 = vrot.slane %v1347_v6, %v1897_v31  ;;  %v1415_v26 = vmul.f32 %v1385_v56, %v444_v51  ;;  %v1351_v39 = vcombine.high %v1347_v6, %v1347_v6  ;;  %v1393_v52 = vrot.slane %v1349_v24, %v1897_v31 }
 0x18a   :  { %v1420_v10 = vpack.c.bf16 %v1412_v30, %v1411_v46  ;;  %v1414_v2 = vmul.f32 %v1381_v33, %v439_v25  ;;  %v1424_v48 = vpack.c.bf16 %v1419_v22, %v1419_v22 }
 0x18b   :  { %v1416_v36 = vmul.f32 %v1389_v45, %v447_v55  ;;  %v1397_v17 = vrot.slane %v1351_v39, %v1897_v31  ;;  %v1417_v43 = vmul.f32 %v1393_v52, %v452_v21 }
 0x18c   :  { %1590 = vmatpush3.bf16.msra.mxu1 %v1420_v10  ;;  %v1421_v12 = vpack.c.bf16 %v1414_v2, %v1413_v37  ;;  %v1432_v31 = vsel %vm1430_vm4, %v1424_v48, 0 }
 0x18d   :  { %1591 = vmatprep.subr.bf16.mxu1 %v2518_v62  ;;  %v1422_v28 = vpack.c.bf16 %v1416_v36, %v1415_v26  ;;  %v1418_v32 = vmul.f32 %v1397_v17, %v455_v20 }
 0x18f   :  { %v1423_v60 = vpack.c.bf16 %v1418_v32, %v1417_v43 }
 0x190   :  { %1592 = vmatpush3.bf16.msra.mxu1 %v1421_v12 }
 0x191   :  { %1593 = vmatprep.subr.bf16.mxu1 %v2518_v62 }
 0x194   :  { %1594 = vmatpush3.bf16.msra.mxu1 %v1422_v28 }
 0x195   :  { %1595 = vmatprep.subr.bf16.mxu1 %v2518_v62 }
 0x198   :  { %1596 = vmatpush3.bf16.msra.mxu1 %v1423_v60 }
 0x199   :  { %1597 = vmatprep.subr.bf16.mxu1 %v2518_v62 }
 0x19c   :  { %1598 = vmatpush3.bf16.msra.mxu1 %v1432_v31 }
 0x19f   :  { %1600 = vmatmul.mubr.msk.bf16.vlgmr.msra.gmra.mrb[24].mxu1 %vm1426_vm5, %v1425_v3 }
 0x272   :  { %v1468_v7 = vpop.f32.mrb[24].mxu1 }
 0x273   :  { %v1469_v49 = vadd.f32 %v1468_v7, %v463_v1  ;;  %v1601_v13 = vpop.f32.mrb[25].mxu1 }
 0x274   :  { %v1471_v38 = vpop.f32.mrb[26].mxu1 }
 0x275   :  { %1474 = vst [vmem:[%s2449_s4] sm:$0xff] %v1469_v49  ;;  %v1602_v4 = vpop.f32.mrb[27].mxu1 }

</bundles_post_ra>
